<compile_context>
chip_gen: v5e
topology: v5e:2x2
jax: 0.10.0
libtpu: 0.0.40
codegen_flags: <defaults>
</compile_context>

<pallas_src>
import functools

import jax
import jax.numpy as jnp
import numpy as np
from jax import lax
from jax.experimental import pallas as pl
from jax.experimental.pallas import tpu as pltpu


def _bert_emb_kernel(ids_ref, pstart_ref,              # scalar prefetch (SMEM)
                     word_hbm,                         # (vocab, H) raw HBM ref
                     pos_tab_ref, type_tab_ref,        # resident VMEM tables
                     tt_ref,                           # (TOK, 1) int32 token types
                     gamma_ref, beta_ref,              # (1, H) f32 LayerNorm params
                     out_ref,                          # (TOK, H) output tile
                     wbuf, sem,                        # scratch: (2, TOK, H), DMA sem (2,)
                     *, eps, tok, tiles_per_seq, n_types):
    i = pl.program_id(0)
    n_tiles = pl.num_programs(0)
    slot = i % 2
    do_unroll = tok <= 64

    def issue_tile(tile_idx, slot_idx):
        # Launch TOK concurrent row DMAs: word table row ids[tile_idx*tok + t].
        def body(t, carry):
            row = ids_ref[tile_idx * tok + t]
            pltpu.make_async_copy(word_hbm.at[row], wbuf.at[slot_idx, t],
                                  sem.at[slot_idx]).start()
            return carry
        lax.fori_loop(0, tok, body, 0, unroll=do_unroll)

    # Prime the double buffer on the very first grid step.
    @pl.when(i == 0)
    def _():
        issue_tile(0, 0)

    # Prefetch the NEXT tile's word rows into the other slot while we compute
    # on the current tile (hides the gather latency).
    @pl.when(i + 1 < n_tiles)
    def _():
        issue_tile(i + 1, 1 - slot)

    # Wait for the TOK row DMAs of the current tile (one wait per issued copy).
    def wait_body(t, carry):
        pltpu.make_async_copy(word_hbm.at[0], wbuf.at[0, 0], sem.at[slot]).wait()
        return carry
    lax.fori_loop(0, tok, wait_body, 0, unroll=do_unroll)

    # word + position + token-type embeddings (f32 accumulation).
    x = wbuf[slot].astype(jnp.float32)                               # (TOK, H)
    pstart = pstart_ref[i % tiles_per_seq]
    x = x + pos_tab_ref[pl.ds(pstart, tok), :].astype(jnp.float32)   # contiguous slice
    tt = tt_ref[...]                                                 # (TOK, 1) int32
    for v in range(n_types):                                         # tiny static loop (=2)
        x = x + jnp.where(tt == v, 1.0, 0.0) * \
            type_tab_ref[v, :][None, :].astype(jnp.float32)

    # LayerNorm over the hidden dimension.
    mean = jnp.mean(x, axis=-1, keepdims=True)
    xc = x - mean
    var = jnp.mean(xc * xc, axis=-1, keepdims=True)
    inv = lax.rsqrt(var + eps)
    y = xc * inv * gamma_ref[...] + beta_ref[...]
    # TODO(synk): dropout is identity here (eval mode); training-mode dropout would
    # need pltpu.prng_seed / prng_random_bits and a keep mask.
    out_ref[...] = y.astype(out_ref.dtype)


def _pick_tok(seq_len, max_tok=512):
    for cand in (512, 256, 128, 64, 32, 16, 8):
        if cand <= max_tok and seq_len % cand == 0:
            return cand
    return None


def bert_embeddings_pallas(input_ids, token_type_ids, position_ids,
                           word_emb, pos_emb, type_emb, gamma, beta,
                           eps=1e-12, tok=None):
    B, S = input_ids.shape
    H = word_emb.shape[1]
    n_types = type_emb.shape[0]
    max_pos = pos_emb.shape[0]
    n_tok = B * S

    if tok is None:
        tok = _pick_tok(S)
    if tok is None or S % tok != 0:
        # TODO(synk): sequences whose length is not a multiple of 8 would need
        # padding of the token stream; not required for this module's configs.
        raise ValueError("sequence length must be a multiple of 8 for this kernel")
    tiles_per_seq = S // tok
    n_tiles = n_tok // tok

    flat_ids = input_ids.reshape(-1).astype(jnp.int32)
    tt2d = token_type_ids.reshape(n_tok, 1).astype(jnp.int32)
    # Per-tile starting row into the position table.  Assumes positions are
    # contiguous (arange) within each TOK-token tile -- true for the module's
    # registered position_ids buffer.
    pos_tile_start = position_ids.reshape(S)[::tok].astype(jnp.int32)

    gamma2 = gamma.reshape(1, H).astype(jnp.float32)
    beta2 = beta.reshape(1, H).astype(jnp.float32)

    kernel = functools.partial(_bert_emb_kernel, eps=eps, tok=tok,
                               tiles_per_seq=tiles_per_seq, n_types=n_types)

    itemsize = jnp.dtype(word_emb.dtype).itemsize
    cost = pl.CostEstimate(
        flops=int(n_tok * H * 10),
        transcendentals=int(n_tok),
        bytes_accessed=int(n_tok * H * itemsize * 3      # word gather + pos rows + output
                           + n_types * H * itemsize      # type table
                           + n_tok * 4 * 2),             # ids + token types
    )

    grid_spec = pltpu.PrefetchScalarGridSpec(
        num_scalar_prefetch=2,
        grid=(n_tiles,),
        in_specs=[
            pl.BlockSpec(memory_space=pl.ANY),                        # word table stays in HBM
            pl.BlockSpec((max_pos, H), lambda i, ids, pst: (0, 0)),   # resident position table
            pl.BlockSpec((n_types, H), lambda i, ids, pst: (0, 0)),   # resident type table
            pl.BlockSpec((tok, 1),     lambda i, ids, pst: (i, 0)),   # token types per tile
            pl.BlockSpec((1, H),       lambda i, ids, pst: (0, 0)),   # gamma (f32)
            pl.BlockSpec((1, H),       lambda i, ids, pst: (0, 0)),   # beta  (f32)
        ],
        out_specs=pl.BlockSpec((tok, H), lambda i, ids, pst: (i, 0)),
        scratch_shapes=[
            pltpu.VMEM((2, tok, H), word_emb.dtype),   # double-buffered gathered word rows
            pltpu.SemaphoreType.DMA((2,)),             # one DMA sem per slot
        ],
    )

    out_flat = pl.pallas_call(
        kernel,
        out_shape=jax.ShapeDtypeStruct((n_tok, H), word_emb.dtype),
        grid_spec=grid_spec,
        compiler_params=pltpu.CompilerParams(
            # The word-row gather is double-buffered across grid steps (scratch
            # carry), so the tile axis must execute sequentially.
            dimension_semantics=("arbitrary",)),
        cost_estimate=cost,
    )(flat_ids, pos_tile_start, word_emb, pos_emb, type_emb, tt2d, gamma2, beta2)

    return out_flat.reshape(B, S, H)


def bert_embeddings_ref(input_ids, token_type_ids, position_ids,
                        word_emb, pos_emb, type_emb, gamma, beta, eps=1e-12):
    """Plain-JAX reference matching the PyTorch forward (eval mode)."""
    B, S = input_ids.shape
    pos_b = jnp.broadcast_to(position_ids, (B, S))
    e = word_emb[input_ids] + type_emb[token_type_ids] + pos_emb[pos_b]
    mean = e.mean(-1, keepdims=True)
    var = ((e - mean) ** 2).mean(-1, keepdims=True)
    return (e - mean) / jnp.sqrt(var + eps) * gamma + beta


if __name__ == "__main__":
    # Small config consistent with the module's __init__.
    vocab_size = 100
    hidden_size = 128
    max_position_embeddings = 64
    type_vocab_size = 2
    pad_token_id = 0
    eps = 1e-12

    batch, seq = 2, 8

    key = jax.random.PRNGKey(0)
    k_w, k_p, k_t, k_g, k_b, k_ids, k_tt = jax.random.split(key, 7)

    # Deterministic parameter init (BERT-style: N(0, 0.02), padding row zeroed).
    word_emb = 0.02 * jax.random.normal(k_w, (vocab_size, hidden_size), jnp.float32)
    word_emb = word_emb.at[pad_token_id].set(0.0)
    pos_emb = 0.02 * jax.random.normal(k_p, (max_position_embeddings, hidden_size), jnp.float32)
    type_emb = 0.02 * jax.random.normal(k_t, (type_vocab_size, hidden_size), jnp.float32)
    gamma = 1.0 + 0.1 * jax.random.normal(k_g, (hidden_size,), jnp.float32)
    beta = 0.1 * jax.random.normal(k_b, (hidden_size,), jnp.float32)

    # Example inputs.
    input_ids = jax.random.randint(k_ids, (batch, seq), 0, vocab_size, dtype=jnp.int32)
    token_type_ids = jax.random.randint(k_tt, (batch, seq), 0, type_vocab_size, dtype=jnp.int32)
    # position_ids buffer: arange(max_position_embeddings)[None, :seq]
    position_ids = jnp.arange(max_position_embeddings, dtype=jnp.int32)[None, :seq]

    out = bert_embeddings_pallas(input_ids, token_type_ids, position_ids,
                                 word_emb, pos_emb, type_emb, gamma, beta, eps)
    out = jax.block_until_ready(out)

    ref = bert_embeddings_ref(input_ids, token_type_ids, position_ids,
                              word_emb, pos_emb, type_emb, gamma, beta, eps)
    np.testing.assert_allclose(np.asarray(out), np.asarray(ref), rtol=1e-5, atol=1e-5)

    print("KERNEL_OK")
</pallas_src>

<mosaic_0001>
module attributes {stable_mosaic.version = 11 : i64} {
  func.func @_bert_emb_kernel(%arg0: i32, %arg1: memref<16xi32, #tpu.memory_space<smem>>, %arg2: memref<1xi32, #tpu.memory_space<smem>>, %arg3: memref<100x128xf32, #tpu.memory_space<any>>, %arg4: memref<64x128xf32, #tpu.memory_space<vmem>>, %arg5: memref<2x128xf32, #tpu.memory_space<vmem>>, %arg6: memref<8x1xi32, #tpu.memory_space<vmem>>, %arg7: memref<1x128xf32, #tpu.memory_space<vmem>>, %arg8: memref<1x128xf32, #tpu.memory_space<vmem>>, %arg9: memref<8x128xf32, #tpu.memory_space<vmem>>, %arg10: memref<2x8x128xf32, #tpu.memory_space<vmem>>, %arg11: memref<2x!tpu.dma_semaphore, #tpu.memory_space<semaphore_mem>>) attributes {dimension_semantics = [#tpu.dimension_semantics<arbitrary>], iteration_bounds = array<i64: 2>, scalar_prefetch = 2 : i64, scratch_operands = 2 : i64, tpu.core_type = #tpu.core_type<tc>, window_params = [{}, {pipeline_mode = #tpu.pipeline_mode<synchronous>, transform_indices = @transform_1, window_bounds = array<i64: 64, 128>}, {pipeline_mode = #tpu.pipeline_mode<synchronous>, transform_indices = @transform_2, window_bounds = array<i64: 2, 128>}, {transform_indices = @transform_3, window_bounds = array<i64: 8, 1>}, {pipeline_mode = #tpu.pipeline_mode<synchronous>, transform_indices = @transform_4, window_bounds = array<i64: 1, 128>}, {pipeline_mode = #tpu.pipeline_mode<synchronous>, transform_indices = @transform_5, window_bounds = array<i64: 1, 128>}, {transform_indices = @transform_6, window_bounds = array<i64: 8, 128>}]} {
    %c2_i32 = arith.constant 2 : i32
    %c0_i32 = arith.constant 0 : i32
    %0 = arith.cmpi eq, %c2_i32, %c0_i32 : i32
    %c1_i32 = arith.constant 1 : i32
    %1 = arith.select %0, %c1_i32, %c2_i32 : i32
    %2 = arith.remsi %arg0, %1 : i32
    %c0_i32_0 = arith.constant 0 : i32
    %3 = arith.cmpi ne, %2, %c0_i32_0 : i32
    %c0_i32_1 = arith.constant 0 : i32
    %4 = arith.cmpi slt, %2, %c0_i32_1 : i32
    %c0_i32_2 = arith.constant 0 : i32
    %5 = arith.cmpi slt, %1, %c0_i32_2 : i32
    %6 = arith.xori %4, %5 : i1
    %7 = arith.andi %6, %3 : i1
    %8 = arith.addi %2, %1 : i32
    %9 = arith.select %7, %8, %2 : i32
    %c0_i32_3 = arith.constant 0 : i32
    %10 = arith.cmpi eq, %arg0, %c0_i32_3 : i32
    %11 = arith.extui %10 : i1 to i32
    %c0_i32_4 = arith.constant 0 : i32
    %12 = arith.cmpi ne, %11, %c0_i32_4 : i32
    scf.if %12 {
      %c0_i32_80 = arith.constant 0 : i32
      %c0_i32_81 = arith.constant 0 : i32
      %131 = arith.addi %c0_i32_81, %c0_i32_80 : i32
      %132 = arith.index_cast %131 : i32 to index
      %133 = memref.load %arg1[%132] : memref<16xi32, #tpu.memory_space<smem>>
      %c0_i32_82 = arith.constant 0 : i32
      %c0_i32_83 = arith.constant 0 : i32
      %c0_i32_84 = arith.constant 0 : i32
      %134 = tpu.memref_slice %arg3[%133, %c0_i32_84] : memref<100x128xf32, #tpu.memory_space<any>> -> memref<1x128xf32, #tpu.memory_space<any>>
      %135 = tpu.memref_squeeze %134 : memref<1x128xf32, #tpu.memory_space<any>> -> memref<128xf32, #tpu.memory_space<any>>
      %c0_i32_85 = arith.constant 0 : i32
      %136 = tpu.memref_slice %arg10[%c0_i32_82, %c0_i32_80, %c0_i32_85] : memref<2x8x128xf32, #tpu.memory_space<vmem>> -> memref<1x1x128xf32, #tpu.memory_space<vmem>>
      %137 = tpu.memref_squeeze %136 : memref<1x1x128xf32, #tpu.memory_space<vmem>> -> memref<128xf32, #tpu.memory_space<vmem>>
      %138 = tpu.memref_slice %arg11[%c0_i32_83] : memref<2x!tpu.dma_semaphore, #tpu.memory_space<semaphore_mem>> -> memref<1x!tpu.dma_semaphore, #tpu.memory_space<semaphore_mem>>
      %139 = tpu.memref_squeeze %138 : memref<1x!tpu.dma_semaphore, #tpu.memory_space<semaphore_mem>> -> memref<!tpu.dma_semaphore, #tpu.memory_space<semaphore_mem>>
      tpu.enqueue_dma source(%135 : memref<128xf32, #tpu.memory_space<any>>) target(%137 : memref<128xf32, #tpu.memory_space<vmem>>) target_semaphore(%139 : memref<!tpu.dma_semaphore, #tpu.memory_space<semaphore_mem>>)
      %c1_i32_86 = arith.constant 1 : i32
      %c0_i32_87 = arith.constant 0 : i32
      %140 = arith.addi %c0_i32_87, %c1_i32_86 : i32
      %141 = arith.index_cast %140 : i32 to index
      %142 = memref.load %arg1[%141] : memref<16xi32, #tpu.memory_space<smem>>
      %c0_i32_88 = arith.constant 0 : i32
      %c0_i32_89 = arith.constant 0 : i32
      %c0_i32_90 = arith.constant 0 : i32
      %143 = tpu.memref_slice %arg3[%142, %c0_i32_90] : memref<100x128xf32, #tpu.memory_space<any>> -> memref<1x128xf32, #tpu.memory_space<any>>
      %144 = tpu.memref_squeeze %143 : memref<1x128xf32, #tpu.memory_space<any>> -> memref<128xf32, #tpu.memory_space<any>>
      %c0_i32_91 = arith.constant 0 : i32
      %145 = tpu.memref_slice %arg10[%c0_i32_88, %c1_i32_86, %c0_i32_91] : memref<2x8x128xf32, #tpu.memory_space<vmem>> -> memref<1x1x128xf32, #tpu.memory_space<vmem>>
      %146 = tpu.memref_squeeze %145 : memref<1x1x128xf32, #tpu.memory_space<vmem>> -> memref<128xf32, #tpu.memory_space<vmem>>
      %147 = tpu.memref_slice %arg11[%c0_i32_89] : memref<2x!tpu.dma_semaphore, #tpu.memory_space<semaphore_mem>> -> memref<1x!tpu.dma_semaphore, #tpu.memory_space<semaphore_mem>>
      %148 = tpu.memref_squeeze %147 : memref<1x!tpu.dma_semaphore, #tpu.memory_space<semaphore_mem>> -> memref<!tpu.dma_semaphore, #tpu.memory_space<semaphore_mem>>
      tpu.enqueue_dma source(%144 : memref<128xf32, #tpu.memory_space<any>>) target(%146 : memref<128xf32, #tpu.memory_space<vmem>>) target_semaphore(%148 : memref<!tpu.dma_semaphore, #tpu.memory_space<semaphore_mem>>)
      %c2_i32_92 = arith.constant 2 : i32
      %c0_i32_93 = arith.constant 0 : i32
      %149 = arith.addi %c0_i32_93, %c2_i32_92 : i32
      %150 = arith.index_cast %149 : i32 to index
      %151 = memref.load %arg1[%150] : memref<16xi32, #tpu.memory_space<smem>>
      %c0_i32_94 = arith.constant 0 : i32
      %c0_i32_95 = arith.constant 0 : i32
      %c0_i32_96 = arith.constant 0 : i32
      %152 = tpu.memref_slice %arg3[%151, %c0_i32_96] : memref<100x128xf32, #tpu.memory_space<any>> -> memref<1x128xf32, #tpu.memory_space<any>>
      %153 = tpu.memref_squeeze %152 : memref<1x128xf32, #tpu.memory_space<any>> -> memref<128xf32, #tpu.memory_space<any>>
      %c0_i32_97 = arith.constant 0 : i32
      %154 = tpu.memref_slice %arg10[%c0_i32_94, %c2_i32_92, %c0_i32_97] : memref<2x8x128xf32, #tpu.memory_space<vmem>> -> memref<1x1x128xf32, #tpu.memory_space<vmem>>
      %155 = tpu.memref_squeeze %154 : memref<1x1x128xf32, #tpu.memory_space<vmem>> -> memref<128xf32, #tpu.memory_space<vmem>>
      %156 = tpu.memref_slice %arg11[%c0_i32_95] : memref<2x!tpu.dma_semaphore, #tpu.memory_space<semaphore_mem>> -> memref<1x!tpu.dma_semaphore, #tpu.memory_space<semaphore_mem>>
      %157 = tpu.memref_squeeze %156 : memref<1x!tpu.dma_semaphore, #tpu.memory_space<semaphore_mem>> -> memref<!tpu.dma_semaphore, #tpu.memory_space<semaphore_mem>>
      tpu.enqueue_dma source(%153 : memref<128xf32, #tpu.memory_space<any>>) target(%155 : memref<128xf32, #tpu.memory_space<vmem>>) target_semaphore(%157 : memref<!tpu.dma_semaphore, #tpu.memory_space<semaphore_mem>>)
      %c3_i32_98 = arith.constant 3 : i32
      %c0_i32_99 = arith.constant 0 : i32
      %158 = arith.addi %c0_i32_99, %c3_i32_98 : i32
      %159 = arith.index_cast %158 : i32 to index
      %160 = memref.load %arg1[%159] : memref<16xi32, #tpu.memory_space<smem>>
      %c0_i32_100 = arith.constant 0 : i32
      %c0_i32_101 = arith.constant 0 : i32
      %c0_i32_102 = arith.constant 0 : i32
      %161 = tpu.memref_slice %arg3[%160, %c0_i32_102] : memref<100x128xf32, #tpu.memory_space<any>> -> memref<1x128xf32, #tpu.memory_space<any>>
      %162 = tpu.memref_squeeze %161 : memref<1x128xf32, #tpu.memory_space<any>> -> memref<128xf32, #tpu.memory_space<any>>
      %c0_i32_103 = arith.constant 0 : i32
      %163 = tpu.memref_slice %arg10[%c0_i32_100, %c3_i32_98, %c0_i32_103] : memref<2x8x128xf32, #tpu.memory_space<vmem>> -> memref<1x1x128xf32, #tpu.memory_space<vmem>>
      %164 = tpu.memref_squeeze %163 : memref<1x1x128xf32, #tpu.memory_space<vmem>> -> memref<128xf32, #tpu.memory_space<vmem>>
      %165 = tpu.memref_slice %arg11[%c0_i32_101] : memref<2x!tpu.dma_semaphore, #tpu.memory_space<semaphore_mem>> -> memref<1x!tpu.dma_semaphore, #tpu.memory_space<semaphore_mem>>
      %166 = tpu.memref_squeeze %165 : memref<1x!tpu.dma_semaphore, #tpu.memory_space<semaphore_mem>> -> memref<!tpu.dma_semaphore, #tpu.memory_space<semaphore_mem>>
      tpu.enqueue_dma source(%162 : memref<128xf32, #tpu.memory_space<any>>) target(%164 : memref<128xf32, #tpu.memory_space<vmem>>) target_semaphore(%166 : memref<!tpu.dma_semaphore, #tpu.memory_space<semaphore_mem>>)
      %c4_i32_104 = arith.constant 4 : i32
      %c0_i32_105 = arith.constant 0 : i32
      %167 = arith.addi %c0_i32_105, %c4_i32_104 : i32
      %168 = arith.index_cast %167 : i32 to index
      %169 = memref.load %arg1[%168] : memref<16xi32, #tpu.memory_space<smem>>
      %c0_i32_106 = arith.constant 0 : i32
      %c0_i32_107 = arith.constant 0 : i32
      %c0_i32_108 = arith.constant 0 : i32
      %170 = tpu.memref_slice %arg3[%169, %c0_i32_108] : memref<100x128xf32, #tpu.memory_space<any>> -> memref<1x128xf32, #tpu.memory_space<any>>
      %171 = tpu.memref_squeeze %170 : memref<1x128xf32, #tpu.memory_space<any>> -> memref<128xf32, #tpu.memory_space<any>>
      %c0_i32_109 = arith.constant 0 : i32
      %172 = tpu.memref_slice %arg10[%c0_i32_106, %c4_i32_104, %c0_i32_109] : memref<2x8x128xf32, #tpu.memory_space<vmem>> -> memref<1x1x128xf32, #tpu.memory_space<vmem>>
      %173 = tpu.memref_squeeze %172 : memref<1x1x128xf32, #tpu.memory_space<vmem>> -> memref<128xf32, #tpu.memory_space<vmem>>
      %174 = tpu.memref_slice %arg11[%c0_i32_107] : memref<2x!tpu.dma_semaphore, #tpu.memory_space<semaphore_mem>> -> memref<1x!tpu.dma_semaphore, #tpu.memory_space<semaphore_mem>>
      %175 = tpu.memref_squeeze %174 : memref<1x!tpu.dma_semaphore, #tpu.memory_space<semaphore_mem>> -> memref<!tpu.dma_semaphore, #tpu.memory_space<semaphore_mem>>
      tpu.enqueue_dma source(%171 : memref<128xf32, #tpu.memory_space<any>>) target(%173 : memref<128xf32, #tpu.memory_space<vmem>>) target_semaphore(%175 : memref<!tpu.dma_semaphore, #tpu.memory_space<semaphore_mem>>)
      %c5_i32_110 = arith.constant 5 : i32
      %c0_i32_111 = arith.constant 0 : i32
      %176 = arith.addi %c0_i32_111, %c5_i32_110 : i32
      %177 = arith.index_cast %176 : i32 to index
      %178 = memref.load %arg1[%177] : memref<16xi32, #tpu.memory_space<smem>>
      %c0_i32_112 = arith.constant 0 : i32
      %c0_i32_113 = arith.constant 0 : i32
      %c0_i32_114 = arith.constant 0 : i32
      %179 = tpu.memref_slice %arg3[%178, %c0_i32_114] : memref<100x128xf32, #tpu.memory_space<any>> -> memref<1x128xf32, #tpu.memory_space<any>>
      %180 = tpu.memref_squeeze %179 : memref<1x128xf32, #tpu.memory_space<any>> -> memref<128xf32, #tpu.memory_space<any>>
      %c0_i32_115 = arith.constant 0 : i32
      %181 = tpu.memref_slice %arg10[%c0_i32_112, %c5_i32_110, %c0_i32_115] : memref<2x8x128xf32, #tpu.memory_space<vmem>> -> memref<1x1x128xf32, #tpu.memory_space<vmem>>
      %182 = tpu.memref_squeeze %181 : memref<1x1x128xf32, #tpu.memory_space<vmem>> -> memref<128xf32, #tpu.memory_space<vmem>>
      %183 = tpu.memref_slice %arg11[%c0_i32_113] : memref<2x!tpu.dma_semaphore, #tpu.memory_space<semaphore_mem>> -> memref<1x!tpu.dma_semaphore, #tpu.memory_space<semaphore_mem>>
      %184 = tpu.memref_squeeze %183 : memref<1x!tpu.dma_semaphore, #tpu.memory_space<semaphore_mem>> -> memref<!tpu.dma_semaphore, #tpu.memory_space<semaphore_mem>>
      tpu.enqueue_dma source(%180 : memref<128xf32, #tpu.memory_space<any>>) target(%182 : memref<128xf32, #tpu.memory_space<vmem>>) target_semaphore(%184 : memref<!tpu.dma_semaphore, #tpu.memory_space<semaphore_mem>>)
      %c6_i32_116 = arith.constant 6 : i32
      %c0_i32_117 = arith.constant 0 : i32
      %185 = arith.addi %c0_i32_117, %c6_i32_116 : i32
      %186 = arith.index_cast %185 : i32 to index
      %187 = memref.load %arg1[%186] : memref<16xi32, #tpu.memory_space<smem>>
      %c0_i32_118 = arith.constant 0 : i32
      %c0_i32_119 = arith.constant 0 : i32
      %c0_i32_120 = arith.constant 0 : i32
      %188 = tpu.memref_slice %arg3[%187, %c0_i32_120] : memref<100x128xf32, #tpu.memory_space<any>> -> memref<1x128xf32, #tpu.memory_space<any>>
      %189 = tpu.memref_squeeze %188 : memref<1x128xf32, #tpu.memory_space<any>> -> memref<128xf32, #tpu.memory_space<any>>
      %c0_i32_121 = arith.constant 0 : i32
      %190 = tpu.memref_slice %arg10[%c0_i32_118, %c6_i32_116, %c0_i32_121] : memref<2x8x128xf32, #tpu.memory_space<vmem>> -> memref<1x1x128xf32, #tpu.memory_space<vmem>>
      %191 = tpu.memref_squeeze %190 : memref<1x1x128xf32, #tpu.memory_space<vmem>> -> memref<128xf32, #tpu.memory_space<vmem>>
      %192 = tpu.memref_slice %arg11[%c0_i32_119] : memref<2x!tpu.dma_semaphore, #tpu.memory_space<semaphore_mem>> -> memref<1x!tpu.dma_semaphore, #tpu.memory_space<semaphore_mem>>
      %193 = tpu.memref_squeeze %192 : memref<1x!tpu.dma_semaphore, #tpu.memory_space<semaphore_mem>> -> memref<!tpu.dma_semaphore, #tpu.memory_space<semaphore_mem>>
      tpu.enqueue_dma source(%189 : memref<128xf32, #tpu.memory_space<any>>) target(%191 : memref<128xf32, #tpu.memory_space<vmem>>) target_semaphore(%193 : memref<!tpu.dma_semaphore, #tpu.memory_space<semaphore_mem>>)
      %c7_i32_122 = arith.constant 7 : i32
      %c0_i32_123 = arith.constant 0 : i32
      %194 = arith.addi %c0_i32_123, %c7_i32_122 : i32
      %195 = arith.index_cast %194 : i32 to index
      %196 = memref.load %arg1[%195] : memref<16xi32, #tpu.memory_space<smem>>
      %c0_i32_124 = arith.constant 0 : i32
      %c0_i32_125 = arith.constant 0 : i32
      %c0_i32_126 = arith.constant 0 : i32
      %197 = tpu.memref_slice %arg3[%196, %c0_i32_126] : memref<100x128xf32, #tpu.memory_space<any>> -> memref<1x128xf32, #tpu.memory_space<any>>
      %198 = tpu.memref_squeeze %197 : memref<1x128xf32, #tpu.memory_space<any>> -> memref<128xf32, #tpu.memory_space<any>>
      %c0_i32_127 = arith.constant 0 : i32
      %199 = tpu.memref_slice %arg10[%c0_i32_124, %c7_i32_122, %c0_i32_127] : memref<2x8x128xf32, #tpu.memory_space<vmem>> -> memref<1x1x128xf32, #tpu.memory_space<vmem>>
      %200 = tpu.memref_squeeze %199 : memref<1x1x128xf32, #tpu.memory_space<vmem>> -> memref<128xf32, #tpu.memory_space<vmem>>
      %201 = tpu.memref_slice %arg11[%c0_i32_125] : memref<2x!tpu.dma_semaphore, #tpu.memory_space<semaphore_mem>> -> memref<1x!tpu.dma_semaphore, #tpu.memory_space<semaphore_mem>>
      %202 = tpu.memref_squeeze %201 : memref<1x!tpu.dma_semaphore, #tpu.memory_space<semaphore_mem>> -> memref<!tpu.dma_semaphore, #tpu.memory_space<semaphore_mem>>
      tpu.enqueue_dma source(%198 : memref<128xf32, #tpu.memory_space<any>>) target(%200 : memref<128xf32, #tpu.memory_space<vmem>>) target_semaphore(%202 : memref<!tpu.dma_semaphore, #tpu.memory_space<semaphore_mem>>)
      %c8_i32 = arith.constant 8 : i32
    } else {
    }
    %c1_i32_5 = arith.constant 1 : i32
    %13 = arith.addi %arg0, %c1_i32_5 : i32
    %c2_i32_6 = arith.constant 2 : i32
    %14 = arith.cmpi slt, %13, %c2_i32_6 : i32
    %15 = arith.extui %14 : i1 to i32
    %c0_i32_7 = arith.constant 0 : i32
    %16 = arith.cmpi ne, %15, %c0_i32_7 : i32
    scf.if %16 {
      %c1_i32_80 = arith.constant 1 : i32
      %131 = arith.addi %arg0, %c1_i32_80 : i32
      %c1_i32_81 = arith.constant 1 : i32
      %132 = arith.subi %c1_i32_81, %9 : i32
      %c0_i32_82 = arith.constant 0 : i32
      %c8_i32 = arith.constant 8 : i32
      %133 = arith.muli %131, %c8_i32 : i32
      %134 = arith.addi %133, %c0_i32_82 : i32
      %135 = arith.index_cast %134 : i32 to index
      %136 = memref.load %arg1[%135] : memref<16xi32, #tpu.memory_space<smem>>
      %c0_i32_83 = arith.constant 0 : i32
      %137 = tpu.memref_slice %arg3[%136, %c0_i32_83] : memref<100x128xf32, #tpu.memory_space<any>> -> memref<1x128xf32, #tpu.memory_space<any>>
      %138 = tpu.memref_squeeze %137 : memref<1x128xf32, #tpu.memory_space<any>> -> memref<128xf32, #tpu.memory_space<any>>
      %c0_i32_84 = arith.constant 0 : i32
      %139 = tpu.memref_slice %arg10[%132, %c0_i32_82, %c0_i32_84] : memref<2x8x128xf32, #tpu.memory_space<vmem>> -> memref<1x1x128xf32, #tpu.memory_space<vmem>>
      %140 = tpu.memref_squeeze %139 : memref<1x1x128xf32, #tpu.memory_space<vmem>> -> memref<128xf32, #tpu.memory_space<vmem>>
      %141 = tpu.memref_slice %arg11[%132] : memref<2x!tpu.dma_semaphore, #tpu.memory_space<semaphore_mem>> -> memref<1x!tpu.dma_semaphore, #tpu.memory_space<semaphore_mem>>
      %142 = tpu.memref_squeeze %141 : memref<1x!tpu.dma_semaphore, #tpu.memory_space<semaphore_mem>> -> memref<!tpu.dma_semaphore, #tpu.memory_space<semaphore_mem>>
      tpu.enqueue_dma source(%138 : memref<128xf32, #tpu.memory_space<any>>) target(%140 : memref<128xf32, #tpu.memory_space<vmem>>) target_semaphore(%142 : memref<!tpu.dma_semaphore, #tpu.memory_space<semaphore_mem>>)
      %c1_i32_85 = arith.constant 1 : i32
      %c8_i32_86 = arith.constant 8 : i32
      %143 = arith.muli %131, %c8_i32_86 : i32
      %144 = arith.addi %143, %c1_i32_85 : i32
      %145 = arith.index_cast %144 : i32 to index
      %146 = memref.load %arg1[%145] : memref<16xi32, #tpu.memory_space<smem>>
      %c0_i32_87 = arith.constant 0 : i32
      %147 = tpu.memref_slice %arg3[%146, %c0_i32_87] : memref<100x128xf32, #tpu.memory_space<any>> -> memref<1x128xf32, #tpu.memory_space<any>>
      %148 = tpu.memref_squeeze %147 : memref<1x128xf32, #tpu.memory_space<any>> -> memref<128xf32, #tpu.memory_space<any>>
      %c0_i32_88 = arith.constant 0 : i32
      %149 = tpu.memref_slice %arg10[%132, %c1_i32_85, %c0_i32_88] : memref<2x8x128xf32, #tpu.memory_space<vmem>> -> memref<1x1x128xf32, #tpu.memory_space<vmem>>
      %150 = tpu.memref_squeeze %149 : memref<1x1x128xf32, #tpu.memory_space<vmem>> -> memref<128xf32, #tpu.memory_space<vmem>>
      %151 = tpu.memref_slice %arg11[%132] : memref<2x!tpu.dma_semaphore, #tpu.memory_space<semaphore_mem>> -> memref<1x!tpu.dma_semaphore, #tpu.memory_space<semaphore_mem>>
      %152 = tpu.memref_squeeze %151 : memref<1x!tpu.dma_semaphore, #tpu.memory_space<semaphore_mem>> -> memref<!tpu.dma_semaphore, #tpu.memory_space<semaphore_mem>>
      tpu.enqueue_dma source(%148 : memref<128xf32, #tpu.memory_space<any>>) target(%150 : memref<128xf32, #tpu.memory_space<vmem>>) target_semaphore(%152 : memref<!tpu.dma_semaphore, #tpu.memory_space<semaphore_mem>>)
      %c2_i32_89 = arith.constant 2 : i32
      %c8_i32_90 = arith.constant 8 : i32
      %153 = arith.muli %131, %c8_i32_90 : i32
      %154 = arith.addi %153, %c2_i32_89 : i32
      %155 = arith.index_cast %154 : i32 to index
      %156 = memref.load %arg1[%155] : memref<16xi32, #tpu.memory_space<smem>>
      %c0_i32_91 = arith.constant 0 : i32
      %157 = tpu.memref_slice %arg3[%156, %c0_i32_91] : memref<100x128xf32, #tpu.memory_space<any>> -> memref<1x128xf32, #tpu.memory_space<any>>
      %158 = tpu.memref_squeeze %157 : memref<1x128xf32, #tpu.memory_space<any>> -> memref<128xf32, #tpu.memory_space<any>>
      %c0_i32_92 = arith.constant 0 : i32
      %159 = tpu.memref_slice %arg10[%132, %c2_i32_89, %c0_i32_92] : memref<2x8x128xf32, #tpu.memory_space<vmem>> -> memref<1x1x128xf32, #tpu.memory_space<vmem>>
      %160 = tpu.memref_squeeze %159 : memref<1x1x128xf32, #tpu.memory_space<vmem>> -> memref<128xf32, #tpu.memory_space<vmem>>
      %161 = tpu.memref_slice %arg11[%132] : memref<2x!tpu.dma_semaphore, #tpu.memory_space<semaphore_mem>> -> memref<1x!tpu.dma_semaphore, #tpu.memory_space<semaphore_mem>>
      %162 = tpu.memref_squeeze %161 : memref<1x!tpu.dma_semaphore, #tpu.memory_space<semaphore_mem>> -> memref<!tpu.dma_semaphore, #tpu.memory_space<semaphore_mem>>
      tpu.enqueue_dma source(%158 : memref<128xf32, #tpu.memory_space<any>>) target(%160 : memref<128xf32, #tpu.memory_space<vmem>>) target_semaphore(%162 : memref<!tpu.dma_semaphore, #tpu.memory_space<semaphore_mem>>)
      %c3_i32_93 = arith.constant 3 : i32
      %c8_i32_94 = arith.constant 8 : i32
      %163 = arith.muli %131, %c8_i32_94 : i32
      %164 = arith.addi %163, %c3_i32_93 : i32
      %165 = arith.index_cast %164 : i32 to index
      %166 = memref.load %arg1[%165] : memref<16xi32, #tpu.memory_space<smem>>
      %c0_i32_95 = arith.constant 0 : i32
      %167 = tpu.memref_slice %arg3[%166, %c0_i32_95] : memref<100x128xf32, #tpu.memory_space<any>> -> memref<1x128xf32, #tpu.memory_space<any>>
      %168 = tpu.memref_squeeze %167 : memref<1x128xf32, #tpu.memory_space<any>> -> memref<128xf32, #tpu.memory_space<any>>
      %c0_i32_96 = arith.constant 0 : i32
      %169 = tpu.memref_slice %arg10[%132, %c3_i32_93, %c0_i32_96] : memref<2x8x128xf32, #tpu.memory_space<vmem>> -> memref<1x1x128xf32, #tpu.memory_space<vmem>>
      %170 = tpu.memref_squeeze %169 : memref<1x1x128xf32, #tpu.memory_space<vmem>> -> memref<128xf32, #tpu.memory_space<vmem>>
      %171 = tpu.memref_slice %arg11[%132] : memref<2x!tpu.dma_semaphore, #tpu.memory_space<semaphore_mem>> -> memref<1x!tpu.dma_semaphore, #tpu.memory_space<semaphore_mem>>
      %172 = tpu.memref_squeeze %171 : memref<1x!tpu.dma_semaphore, #tpu.memory_space<semaphore_mem>> -> memref<!tpu.dma_semaphore, #tpu.memory_space<semaphore_mem>>
      tpu.enqueue_dma source(%168 : memref<128xf32, #tpu.memory_space<any>>) target(%170 : memref<128xf32, #tpu.memory_space<vmem>>) target_semaphore(%172 : memref<!tpu.dma_semaphore, #tpu.memory_space<semaphore_mem>>)
      %c4_i32_97 = arith.constant 4 : i32
      %c8_i32_98 = arith.constant 8 : i32
      %173 = arith.muli %131, %c8_i32_98 : i32
      %174 = arith.addi %173, %c4_i32_97 : i32
      %175 = arith.index_cast %174 : i32 to index
      %176 = memref.load %arg1[%175] : memref<16xi32, #tpu.memory_space<smem>>
      %c0_i32_99 = arith.constant 0 : i32
      %177 = tpu.memref_slice %arg3[%176, %c0_i32_99] : memref<100x128xf32, #tpu.memory_space<any>> -> memref<1x128xf32, #tpu.memory_space<any>>
      %178 = tpu.memref_squeeze %177 : memref<1x128xf32, #tpu.memory_space<any>> -> memref<128xf32, #tpu.memory_space<any>>
      %c0_i32_100 = arith.constant 0 : i32
      %179 = tpu.memref_slice %arg10[%132, %c4_i32_97, %c0_i32_100] : memref<2x8x128xf32, #tpu.memory_space<vmem>> -> memref<1x1x128xf32, #tpu.memory_space<vmem>>
      %180 = tpu.memref_squeeze %179 : memref<1x1x128xf32, #tpu.memory_space<vmem>> -> memref<128xf32, #tpu.memory_space<vmem>>
      %181 = tpu.memref_slice %arg11[%132] : memref<2x!tpu.dma_semaphore, #tpu.memory_space<semaphore_mem>> -> memref<1x!tpu.dma_semaphore, #tpu.memory_space<semaphore_mem>>
      %182 = tpu.memref_squeeze %181 : memref<1x!tpu.dma_semaphore, #tpu.memory_space<semaphore_mem>> -> memref<!tpu.dma_semaphore, #tpu.memory_space<semaphore_mem>>
      tpu.enqueue_dma source(%178 : memref<128xf32, #tpu.memory_space<any>>) target(%180 : memref<128xf32, #tpu.memory_space<vmem>>) target_semaphore(%182 : memref<!tpu.dma_semaphore, #tpu.memory_space<semaphore_mem>>)
      %c5_i32_101 = arith.constant 5 : i32
      %c8_i32_102 = arith.constant 8 : i32
      %183 = arith.muli %131, %c8_i32_102 : i32
      %184 = arith.addi %183, %c5_i32_101 : i32
      %185 = arith.index_cast %184 : i32 to index
      %186 = memref.load %arg1[%185] : memref<16xi32, #tpu.memory_space<smem>>
      %c0_i32_103 = arith.constant 0 : i32
      %187 = tpu.memref_slice %arg3[%186, %c0_i32_103] : memref<100x128xf32, #tpu.memory_space<any>> -> memref<1x128xf32, #tpu.memory_space<any>>
      %188 = tpu.memref_squeeze %187 : memref<1x128xf32, #tpu.memory_space<any>> -> memref<128xf32, #tpu.memory_space<any>>
      %c0_i32_104 = arith.constant 0 : i32
      %189 = tpu.memref_slice %arg10[%132, %c5_i32_101, %c0_i32_104] : memref<2x8x128xf32, #tpu.memory_space<vmem>> -> memref<1x1x128xf32, #tpu.memory_space<vmem>>
      %190 = tpu.memref_squeeze %189 : memref<1x1x128xf32, #tpu.memory_space<vmem>> -> memref<128xf32, #tpu.memory_space<vmem>>
      %191 = tpu.memref_slice %arg11[%132] : memref<2x!tpu.dma_semaphore, #tpu.memory_space<semaphore_mem>> -> memref<1x!tpu.dma_semaphore, #tpu.memory_space<semaphore_mem>>
      %192 = tpu.memref_squeeze %191 : memref<1x!tpu.dma_semaphore, #tpu.memory_space<semaphore_mem>> -> memref<!tpu.dma_semaphore, #tpu.memory_space<semaphore_mem>>
      tpu.enqueue_dma source(%188 : memref<128xf32, #tpu.memory_space<any>>) target(%190 : memref<128xf32, #tpu.memory_space<vmem>>) target_semaphore(%192 : memref<!tpu.dma_semaphore, #tpu.memory_space<semaphore_mem>>)
      %c6_i32_105 = arith.constant 6 : i32
      %c8_i32_106 = arith.constant 8 : i32
      %193 = arith.muli %131, %c8_i32_106 : i32
      %194 = arith.addi %193, %c6_i32_105 : i32
      %195 = arith.index_cast %194 : i32 to index
      %196 = memref.load %arg1[%195] : memref<16xi32, #tpu.memory_space<smem>>
      %c0_i32_107 = arith.constant 0 : i32
      %197 = tpu.memref_slice %arg3[%196, %c0_i32_107] : memref<100x128xf32, #tpu.memory_space<any>> -> memref<1x128xf32, #tpu.memory_space<any>>
      %198 = tpu.memref_squeeze %197 : memref<1x128xf32, #tpu.memory_space<any>> -> memref<128xf32, #tpu.memory_space<any>>
      %c0_i32_108 = arith.constant 0 : i32
      %199 = tpu.memref_slice %arg10[%132, %c6_i32_105, %c0_i32_108] : memref<2x8x128xf32, #tpu.memory_space<vmem>> -> memref<1x1x128xf32, #tpu.memory_space<vmem>>
      %200 = tpu.memref_squeeze %199 : memref<1x1x128xf32, #tpu.memory_space<vmem>> -> memref<128xf32, #tpu.memory_space<vmem>>
      %201 = tpu.memref_slice %arg11[%132] : memref<2x!tpu.dma_semaphore, #tpu.memory_space<semaphore_mem>> -> memref<1x!tpu.dma_semaphore, #tpu.memory_space<semaphore_mem>>
      %202 = tpu.memref_squeeze %201 : memref<1x!tpu.dma_semaphore, #tpu.memory_space<semaphore_mem>> -> memref<!tpu.dma_semaphore, #tpu.memory_space<semaphore_mem>>
      tpu.enqueue_dma source(%198 : memref<128xf32, #tpu.memory_space<any>>) target(%200 : memref<128xf32, #tpu.memory_space<vmem>>) target_semaphore(%202 : memref<!tpu.dma_semaphore, #tpu.memory_space<semaphore_mem>>)
      %c7_i32_109 = arith.constant 7 : i32
      %c8_i32_110 = arith.constant 8 : i32
      %203 = arith.muli %131, %c8_i32_110 : i32
      %204 = arith.addi %203, %c7_i32_109 : i32
      %205 = arith.index_cast %204 : i32 to index
      %206 = memref.load %arg1[%205] : memref<16xi32, #tpu.memory_space<smem>>
      %c0_i32_111 = arith.constant 0 : i32
      %207 = tpu.memref_slice %arg3[%206, %c0_i32_111] : memref<100x128xf32, #tpu.memory_space<any>> -> memref<1x128xf32, #tpu.memory_space<any>>
      %208 = tpu.memref_squeeze %207 : memref<1x128xf32, #tpu.memory_space<any>> -> memref<128xf32, #tpu.memory_space<any>>
      %c0_i32_112 = arith.constant 0 : i32
      %209 = tpu.memref_slice %arg10[%132, %c7_i32_109, %c0_i32_112] : memref<2x8x128xf32, #tpu.memory_space<vmem>> -> memref<1x1x128xf32, #tpu.memory_space<vmem>>
      %210 = tpu.memref_squeeze %209 : memref<1x1x128xf32, #tpu.memory_space<vmem>> -> memref<128xf32, #tpu.memory_space<vmem>>
      %211 = tpu.memref_slice %arg11[%132] : memref<2x!tpu.dma_semaphore, #tpu.memory_space<semaphore_mem>> -> memref<1x!tpu.dma_semaphore, #tpu.memory_space<semaphore_mem>>
      %212 = tpu.memref_squeeze %211 : memref<1x!tpu.dma_semaphore, #tpu.memory_space<semaphore_mem>> -> memref<!tpu.dma_semaphore, #tpu.memory_space<semaphore_mem>>
      tpu.enqueue_dma source(%208 : memref<128xf32, #tpu.memory_space<any>>) target(%210 : memref<128xf32, #tpu.memory_space<vmem>>) target_semaphore(%212 : memref<!tpu.dma_semaphore, #tpu.memory_space<semaphore_mem>>)
      %c8_i32_113 = arith.constant 8 : i32
    } else {
    }
    %c0_i32_8 = arith.constant 0 : i32
    %c0_i32_9 = arith.constant 0 : i32
    %c0_i32_10 = arith.constant 0 : i32
    %c0_i32_11 = arith.constant 0 : i32
    %c0_i32_12 = arith.constant 0 : i32
    %17 = tpu.memref_slice %arg3[%c0_i32_9, %c0_i32_12] : memref<100x128xf32, #tpu.memory_space<any>> -> memref<1x128xf32, #tpu.memory_space<any>>
    %18 = tpu.memref_squeeze %17 : memref<1x128xf32, #tpu.memory_space<any>> -> memref<128xf32, #tpu.memory_space<any>>
    %c0_i32_13 = arith.constant 0 : i32
    %19 = tpu.memref_slice %arg10[%c0_i32_10, %c0_i32_11, %c0_i32_13] : memref<2x8x128xf32, #tpu.memory_space<vmem>> -> memref<1x1x128xf32, #tpu.memory_space<vmem>>
    %20 = tpu.memref_squeeze %19 : memref<1x1x128xf32, #tpu.memory_space<vmem>> -> memref<128xf32, #tpu.memory_space<vmem>>
    %21 = tpu.memref_slice %arg11[%9] : memref<2x!tpu.dma_semaphore, #tpu.memory_space<semaphore_mem>> -> memref<1x!tpu.dma_semaphore, #tpu.memory_space<semaphore_mem>>
    %22 = tpu.memref_squeeze %21 : memref<1x!tpu.dma_semaphore, #tpu.memory_space<semaphore_mem>> -> memref<!tpu.dma_semaphore, #tpu.memory_space<semaphore_mem>>
    tpu.wait_dma2 semaphore(%22 : memref<!tpu.dma_semaphore, #tpu.memory_space<semaphore_mem>>) src(%18 : memref<128xf32, #tpu.memory_space<any>>) dst(%20 : memref<128xf32, #tpu.memory_space<vmem>>)
    %c1_i32_14 = arith.constant 1 : i32
    %c0_i32_15 = arith.constant 0 : i32
    %c0_i32_16 = arith.constant 0 : i32
    %c0_i32_17 = arith.constant 0 : i32
    %c0_i32_18 = arith.constant 0 : i32
    %23 = tpu.memref_slice %arg3[%c0_i32_15, %c0_i32_18] : memref<100x128xf32, #tpu.memory_space<any>> -> memref<1x128xf32, #tpu.memory_space<any>>
    %24 = tpu.memref_squeeze %23 : memref<1x128xf32, #tpu.memory_space<any>> -> memref<128xf32, #tpu.memory_space<any>>
    %c0_i32_19 = arith.constant 0 : i32
    %25 = tpu.memref_slice %arg10[%c0_i32_16, %c0_i32_17, %c0_i32_19] : memref<2x8x128xf32, #tpu.memory_space<vmem>> -> memref<1x1x128xf32, #tpu.memory_space<vmem>>
    %26 = tpu.memref_squeeze %25 : memref<1x1x128xf32, #tpu.memory_space<vmem>> -> memref<128xf32, #tpu.memory_space<vmem>>
    %27 = tpu.memref_slice %arg11[%9] : memref<2x!tpu.dma_semaphore, #tpu.memory_space<semaphore_mem>> -> memref<1x!tpu.dma_semaphore, #tpu.memory_space<semaphore_mem>>
    %28 = tpu.memref_squeeze %27 : memref<1x!tpu.dma_semaphore, #tpu.memory_space<semaphore_mem>> -> memref<!tpu.dma_semaphore, #tpu.memory_space<semaphore_mem>>
    tpu.wait_dma2 semaphore(%28 : memref<!tpu.dma_semaphore, #tpu.memory_space<semaphore_mem>>) src(%24 : memref<128xf32, #tpu.memory_space<any>>) dst(%26 : memref<128xf32, #tpu.memory_space<vmem>>)
    %c2_i32_20 = arith.constant 2 : i32
    %c0_i32_21 = arith.constant 0 : i32
    %c0_i32_22 = arith.constant 0 : i32
    %c0_i32_23 = arith.constant 0 : i32
    %c0_i32_24 = arith.constant 0 : i32
    %29 = tpu.memref_slice %arg3[%c0_i32_21, %c0_i32_24] : memref<100x128xf32, #tpu.memory_space<any>> -> memref<1x128xf32, #tpu.memory_space<any>>
    %30 = tpu.memref_squeeze %29 : memref<1x128xf32, #tpu.memory_space<any>> -> memref<128xf32, #tpu.memory_space<any>>
    %c0_i32_25 = arith.constant 0 : i32
    %31 = tpu.memref_slice %arg10[%c0_i32_22, %c0_i32_23, %c0_i32_25] : memref<2x8x128xf32, #tpu.memory_space<vmem>> -> memref<1x1x128xf32, #tpu.memory_space<vmem>>
    %32 = tpu.memref_squeeze %31 : memref<1x1x128xf32, #tpu.memory_space<vmem>> -> memref<128xf32, #tpu.memory_space<vmem>>
    %33 = tpu.memref_slice %arg11[%9] : memref<2x!tpu.dma_semaphore, #tpu.memory_space<semaphore_mem>> -> memref<1x!tpu.dma_semaphore, #tpu.memory_space<semaphore_mem>>
    %34 = tpu.memref_squeeze %33 : memref<1x!tpu.dma_semaphore, #tpu.memory_space<semaphore_mem>> -> memref<!tpu.dma_semaphore, #tpu.memory_space<semaphore_mem>>
    tpu.wait_dma2 semaphore(%34 : memref<!tpu.dma_semaphore, #tpu.memory_space<semaphore_mem>>) src(%30 : memref<128xf32, #tpu.memory_space<any>>) dst(%32 : memref<128xf32, #tpu.memory_space<vmem>>)
    %c3_i32 = arith.constant 3 : i32
    %c0_i32_26 = arith.constant 0 : i32
    %c0_i32_27 = arith.constant 0 : i32
    %c0_i32_28 = arith.constant 0 : i32
    %c0_i32_29 = arith.constant 0 : i32
    %35 = tpu.memref_slice %arg3[%c0_i32_26, %c0_i32_29] : memref<100x128xf32, #tpu.memory_space<any>> -> memref<1x128xf32, #tpu.memory_space<any>>
    %36 = tpu.memref_squeeze %35 : memref<1x128xf32, #tpu.memory_space<any>> -> memref<128xf32, #tpu.memory_space<any>>
    %c0_i32_30 = arith.constant 0 : i32
    %37 = tpu.memref_slice %arg10[%c0_i32_27, %c0_i32_28, %c0_i32_30] : memref<2x8x128xf32, #tpu.memory_space<vmem>> -> memref<1x1x128xf32, #tpu.memory_space<vmem>>
    %38 = tpu.memref_squeeze %37 : memref<1x1x128xf32, #tpu.memory_space<vmem>> -> memref<128xf32, #tpu.memory_space<vmem>>
    %39 = tpu.memref_slice %arg11[%9] : memref<2x!tpu.dma_semaphore, #tpu.memory_space<semaphore_mem>> -> memref<1x!tpu.dma_semaphore, #tpu.memory_space<semaphore_mem>>
    %40 = tpu.memref_squeeze %39 : memref<1x!tpu.dma_semaphore, #tpu.memory_space<semaphore_mem>> -> memref<!tpu.dma_semaphore, #tpu.memory_space<semaphore_mem>>
    tpu.wait_dma2 semaphore(%40 : memref<!tpu.dma_semaphore, #tpu.memory_space<semaphore_mem>>) src(%36 : memref<128xf32, #tpu.memory_space<any>>) dst(%38 : memref<128xf32, #tpu.memory_space<vmem>>)
    %c4_i32 = arith.constant 4 : i32
    %c0_i32_31 = arith.constant 0 : i32
    %c0_i32_32 = arith.constant 0 : i32
    %c0_i32_33 = arith.constant 0 : i32
    %c0_i32_34 = arith.constant 0 : i32
    %41 = tpu.memref_slice %arg3[%c0_i32_31, %c0_i32_34] : memref<100x128xf32, #tpu.memory_space<any>> -> memref<1x128xf32, #tpu.memory_space<any>>
    %42 = tpu.memref_squeeze %41 : memref<1x128xf32, #tpu.memory_space<any>> -> memref<128xf32, #tpu.memory_space<any>>
    %c0_i32_35 = arith.constant 0 : i32
    %43 = tpu.memref_slice %arg10[%c0_i32_32, %c0_i32_33, %c0_i32_35] : memref<2x8x128xf32, #tpu.memory_space<vmem>> -> memref<1x1x128xf32, #tpu.memory_space<vmem>>
    %44 = tpu.memref_squeeze %43 : memref<1x1x128xf32, #tpu.memory_space<vmem>> -> memref<128xf32, #tpu.memory_space<vmem>>
    %45 = tpu.memref_slice %arg11[%9] : memref<2x!tpu.dma_semaphore, #tpu.memory_space<semaphore_mem>> -> memref<1x!tpu.dma_semaphore, #tpu.memory_space<semaphore_mem>>
    %46 = tpu.memref_squeeze %45 : memref<1x!tpu.dma_semaphore, #tpu.memory_space<semaphore_mem>> -> memref<!tpu.dma_semaphore, #tpu.memory_space<semaphore_mem>>
    tpu.wait_dma2 semaphore(%46 : memref<!tpu.dma_semaphore, #tpu.memory_space<semaphore_mem>>) src(%42 : memref<128xf32, #tpu.memory_space<any>>) dst(%44 : memref<128xf32, #tpu.memory_space<vmem>>)
    %c5_i32 = arith.constant 5 : i32
    %c0_i32_36 = arith.constant 0 : i32
    %c0_i32_37 = arith.constant 0 : i32
    %c0_i32_38 = arith.constant 0 : i32
    %c0_i32_39 = arith.constant 0 : i32
    %47 = tpu.memref_slice %arg3[%c0_i32_36, %c0_i32_39] : memref<100x128xf32, #tpu.memory_space<any>> -> memref<1x128xf32, #tpu.memory_space<any>>
    %48 = tpu.memref_squeeze %47 : memref<1x128xf32, #tpu.memory_space<any>> -> memref<128xf32, #tpu.memory_space<any>>
    %c0_i32_40 = arith.constant 0 : i32
    %49 = tpu.memref_slice %arg10[%c0_i32_37, %c0_i32_38, %c0_i32_40] : memref<2x8x128xf32, #tpu.memory_space<vmem>> -> memref<1x1x128xf32, #tpu.memory_space<vmem>>
    %50 = tpu.memref_squeeze %49 : memref<1x1x128xf32, #tpu.memory_space<vmem>> -> memref<128xf32, #tpu.memory_space<vmem>>
    %51 = tpu.memref_slice %arg11[%9] : memref<2x!tpu.dma_semaphore, #tpu.memory_space<semaphore_mem>> -> memref<1x!tpu.dma_semaphore, #tpu.memory_space<semaphore_mem>>
    %52 = tpu.memref_squeeze %51 : memref<1x!tpu.dma_semaphore, #tpu.memory_space<semaphore_mem>> -> memref<!tpu.dma_semaphore, #tpu.memory_space<semaphore_mem>>
    tpu.wait_dma2 semaphore(%52 : memref<!tpu.dma_semaphore, #tpu.memory_space<semaphore_mem>>) src(%48 : memref<128xf32, #tpu.memory_space<any>>) dst(%50 : memref<128xf32, #tpu.memory_space<vmem>>)
    %c6_i32 = arith.constant 6 : i32
    %c0_i32_41 = arith.constant 0 : i32
    %c0_i32_42 = arith.constant 0 : i32
    %c0_i32_43 = arith.constant 0 : i32
    %c0_i32_44 = arith.constant 0 : i32
    %53 = tpu.memref_slice %arg3[%c0_i32_41, %c0_i32_44] : memref<100x128xf32, #tpu.memory_space<any>> -> memref<1x128xf32, #tpu.memory_space<any>>
    %54 = tpu.memref_squeeze %53 : memref<1x128xf32, #tpu.memory_space<any>> -> memref<128xf32, #tpu.memory_space<any>>
    %c0_i32_45 = arith.constant 0 : i32
    %55 = tpu.memref_slice %arg10[%c0_i32_42, %c0_i32_43, %c0_i32_45] : memref<2x8x128xf32, #tpu.memory_space<vmem>> -> memref<1x1x128xf32, #tpu.memory_space<vmem>>
    %56 = tpu.memref_squeeze %55 : memref<1x1x128xf32, #tpu.memory_space<vmem>> -> memref<128xf32, #tpu.memory_space<vmem>>
    %57 = tpu.memref_slice %arg11[%9] : memref<2x!tpu.dma_semaphore, #tpu.memory_space<semaphore_mem>> -> memref<1x!tpu.dma_semaphore, #tpu.memory_space<semaphore_mem>>
    %58 = tpu.memref_squeeze %57 : memref<1x!tpu.dma_semaphore, #tpu.memory_space<semaphore_mem>> -> memref<!tpu.dma_semaphore, #tpu.memory_space<semaphore_mem>>
    tpu.wait_dma2 semaphore(%58 : memref<!tpu.dma_semaphore, #tpu.memory_space<semaphore_mem>>) src(%54 : memref<128xf32, #tpu.memory_space<any>>) dst(%56 : memref<128xf32, #tpu.memory_space<vmem>>)
    %c7_i32 = arith.constant 7 : i32
    %c0_i32_46 = arith.constant 0 : i32
    %c0_i32_47 = arith.constant 0 : i32
    %c0_i32_48 = arith.constant 0 : i32
    %c0_i32_49 = arith.constant 0 : i32
    %59 = tpu.memref_slice %arg3[%c0_i32_46, %c0_i32_49] : memref<100x128xf32, #tpu.memory_space<any>> -> memref<1x128xf32, #tpu.memory_space<any>>
    %60 = tpu.memref_squeeze %59 : memref<1x128xf32, #tpu.memory_space<any>> -> memref<128xf32, #tpu.memory_space<any>>
    %c0_i32_50 = arith.constant 0 : i32
    %61 = tpu.memref_slice %arg10[%c0_i32_47, %c0_i32_48, %c0_i32_50] : memref<2x8x128xf32, #tpu.memory_space<vmem>> -> memref<1x1x128xf32, #tpu.memory_space<vmem>>
    %62 = tpu.memref_squeeze %61 : memref<1x1x128xf32, #tpu.memory_space<vmem>> -> memref<128xf32, #tpu.memory_space<vmem>>
    %63 = tpu.memref_slice %arg11[%9] : memref<2x!tpu.dma_semaphore, #tpu.memory_space<semaphore_mem>> -> memref<1x!tpu.dma_semaphore, #tpu.memory_space<semaphore_mem>>
    %64 = tpu.memref_squeeze %63 : memref<1x!tpu.dma_semaphore, #tpu.memory_space<semaphore_mem>> -> memref<!tpu.dma_semaphore, #tpu.memory_space<semaphore_mem>>
    tpu.wait_dma2 semaphore(%64 : memref<!tpu.dma_semaphore, #tpu.memory_space<semaphore_mem>>) src(%60 : memref<128xf32, #tpu.memory_space<any>>) dst(%62 : memref<128xf32, #tpu.memory_space<vmem>>)
    %65 = arith.index_cast %9 : i32 to index
    %c0 = arith.constant 0 : index
    %c0_51 = arith.constant 0 : index
    %66 = vector.load %arg10[%65, %c0, %c0_51] : memref<2x8x128xf32, #tpu.memory_space<vmem>>, vector<1x8x128xf32>
    %67 = vector.shape_cast %66 : vector<1x8x128xf32> to vector<8x128xf32>
    %c1_i32_52 = arith.constant 1 : i32
    %c0_i32_53 = arith.constant 0 : i32
    %68 = arith.cmpi eq, %c1_i32_52, %c0_i32_53 : i32
    %c1_i32_54 = arith.constant 1 : i32
    %69 = arith.select %68, %c1_i32_54, %c1_i32_52 : i32
    %70 = arith.remsi %arg0, %69 : i32
    %c0_i32_55 = arith.constant 0 : i32
    %71 = arith.cmpi ne, %70, %c0_i32_55 : i32
    %c0_i32_56 = arith.constant 0 : i32
    %72 = arith.cmpi slt, %70, %c0_i32_56 : i32
    %c0_i32_57 = arith.constant 0 : i32
    %73 = arith.cmpi slt, %69, %c0_i32_57 : i32
    %74 = arith.xori %72, %73 : i1
    %75 = arith.andi %74, %71 : i1
    %76 = arith.addi %70, %69 : i32
    %77 = arith.select %75, %76, %70 : i32
    %78 = arith.index_cast %77 : i32 to index
    %79 = memref.load %arg2[%78] : memref<1xi32, #tpu.memory_space<smem>>
    %80 = arith.index_cast %79 : i32 to index
    %c0_58 = arith.constant 0 : index
    %81 = vector.load %arg4[%80, %c0_58] : memref<64x128xf32, #tpu.memory_space<vmem>>, vector<8x128xf32>
    %82 = arith.addf %67, %81 : vector<8x128xf32>
    %c0_59 = arith.constant 0 : index
    %c0_60 = arith.constant 0 : index
    %83 = vector.load %arg6[%c0_59, %c0_60] : memref<8x1xi32, #tpu.memory_space<vmem>>, vector<8x1xi32>
    %c0_i32_61 = arith.constant 0 : i32
    %84 = vector.broadcast %c0_i32_61 : i32 to vector<8x1xi32>
    %85 = arith.cmpi eq, %83, %84 : vector<8x1xi32>
    %cst = arith.constant 1.000000e+00 : f32
    %cst_62 = arith.constant 0.000000e+00 : f32
    %86 = vector.broadcast %cst : f32 to vector<8x1xf32>
    %87 = vector.broadcast %cst_62 : f32 to vector<8x1xf32>
    %88 = arith.select %85, %86, %87 : vector<8x1xi1>, vector<8x1xf32>
    %c0_63 = arith.constant 0 : index
    %c0_64 = arith.constant 0 : index
    %89 = vector.load %arg5[%c0_63, %c0_64] : memref<2x128xf32, #tpu.memory_space<vmem>>, vector<1x128xf32>
    %90 = vector.shape_cast %89 : vector<1x128xf32> to vector<128xf32>
    %91 = vector.shape_cast %90 : vector<128xf32> to vector<1x128xf32>
    %92 = vector.broadcast %88 : vector<8x1xf32> to vector<8x128xf32>
    %93 = vector.broadcast %91 : vector<1x128xf32> to vector<8x128xf32>
    %94 = arith.mulf %92, %93 : vector<8x128xf32>
    %95 = arith.addf %82, %94 : vector<8x128xf32>
    %c1_i32_65 = arith.constant 1 : i32
    %96 = vector.broadcast %c1_i32_65 : i32 to vector<8x1xi32>
    %97 = arith.cmpi eq, %83, %96 : vector<8x1xi32>
    %cst_66 = arith.constant 1.000000e+00 : f32
    %cst_67 = arith.constant 0.000000e+00 : f32
    %98 = vector.broadcast %cst_66 : f32 to vector<8x1xf32>
    %99 = vector.broadcast %cst_67 : f32 to vector<8x1xf32>
    %100 = arith.select %97, %98, %99 : vector<8x1xi1>, vector<8x1xf32>
    %c1 = arith.constant 1 : index
    %c0_68 = arith.constant 0 : index
    %101 = vector.load %arg5[%c1, %c0_68] : memref<2x128xf32, #tpu.memory_space<vmem>>, vector<1x128xf32>
    %102 = vector.shape_cast %101 : vector<1x128xf32> to vector<128xf32>
    %103 = vector.shape_cast %102 : vector<128xf32> to vector<1x128xf32>
    %104 = vector.broadcast %100 : vector<8x1xf32> to vector<8x128xf32>
    %105 = vector.broadcast %103 : vector<1x128xf32> to vector<8x128xf32>
    %106 = arith.mulf %104, %105 : vector<8x128xf32>
    %107 = arith.addf %95, %106 : vector<8x128xf32>
    %cst_69 = arith.constant dense<0.000000e+00> : vector<8xf32>
    %108 = vector.multi_reduction <add>, %107, %cst_69 [1] : vector<8x128xf32> to vector<8xf32>
    %109 = vector.shape_cast %108 : vector<8xf32> to vector<8x1xf32>
    %cst_70 = arith.constant 1.280000e+02 : f32
    %110 = vector.broadcast %cst_70 : f32 to vector<8x1xf32>
    %111 = arith.divf %109, %110 : vector<8x1xf32>
    %112 = vector.broadcast %111 : vector<8x1xf32> to vector<8x128xf32>
    %113 = arith.subf %107, %112 : vector<8x128xf32>
    %114 = arith.mulf %113, %113 : vector<8x128xf32>
    %cst_71 = arith.constant dense<0.000000e+00> : vector<8xf32>
    %115 = vector.multi_reduction <add>, %114, %cst_71 [1] : vector<8x128xf32> to vector<8xf32>
    %116 = vector.shape_cast %115 : vector<8xf32> to vector<8x1xf32>
    %cst_72 = arith.constant 1.280000e+02 : f32
    %117 = vector.broadcast %cst_72 : f32 to vector<8x1xf32>
    %118 = arith.divf %116, %117 : vector<8x1xf32>
    %cst_73 = arith.constant 9.99999996E-13 : f32
    %119 = vector.broadcast %cst_73 : f32 to vector<8x1xf32>
    %120 = arith.addf %118, %119 : vector<8x1xf32>
    %121 = math.rsqrt %120 : vector<8x1xf32>
    %122 = vector.broadcast %121 : vector<8x1xf32> to vector<8x128xf32>
    %123 = arith.mulf %113, %122 : vector<8x128xf32>
    %c0_74 = arith.constant 0 : index
    %c0_75 = arith.constant 0 : index
    %124 = vector.load %arg7[%c0_74, %c0_75] : memref<1x128xf32, #tpu.memory_space<vmem>>, vector<1x128xf32>
    %125 = vector.broadcast %124 : vector<1x128xf32> to vector<8x128xf32>
    %126 = arith.mulf %123, %125 : vector<8x128xf32>
    %c0_76 = arith.constant 0 : index
    %c0_77 = arith.constant 0 : index
    %127 = vector.load %arg8[%c0_76, %c0_77] : memref<1x128xf32, #tpu.memory_space<vmem>>, vector<1x128xf32>
    %128 = vector.broadcast %127 : vector<1x128xf32> to vector<8x128xf32>
    %129 = arith.addf %126, %128 : vector<8x128xf32>
    %c0_78 = arith.constant 0 : index
    %c0_79 = arith.constant 0 : index
    %130 = vector.load %arg9[%c0_78, %c0_79] : memref<8x128xf32, #tpu.memory_space<vmem>>, vector<8x128xf32>
    tpu.vector_store %arg9[%c0_78, %c0_79], %129 {strides = array<i32>} : memref<8x128xf32, #tpu.memory_space<vmem>>, vector<8x128xf32>,
    return
  }
  func.func @transform_1(%arg0: i32, %arg1: memref<16xi32, #tpu.memory_space<smem>>, %arg2: memref<1xi32, #tpu.memory_space<smem>>) -> (i32, i32) {
    %c0_i32 = arith.constant 0 : i32
    %c0_i32_0 = arith.constant 0 : i32
    %c0_i32_1 = arith.constant 0 : i32
    return %c0_i32, %c0_i32_0 : i32, i32
  }
  func.func @transform_2(%arg0: i32, %arg1: memref<16xi32, #tpu.memory_space<smem>>, %arg2: memref<1xi32, #tpu.memory_space<smem>>) -> (i32, i32) {
    %c0_i32 = arith.constant 0 : i32
    %c0_i32_0 = arith.constant 0 : i32
    %c0_i32_1 = arith.constant 0 : i32
    return %c0_i32, %c0_i32_0 : i32, i32
  }
  func.func @transform_3(%arg0: i32, %arg1: memref<16xi32, #tpu.memory_space<smem>>, %arg2: memref<1xi32, #tpu.memory_space<smem>>) -> (i32, i32) {
    %c0_i32 = arith.constant 0 : i32
    %c0_i32_0 = arith.constant 0 : i32
    return %arg0, %c0_i32 : i32, i32
  }
  func.func @transform_4(%arg0: i32, %arg1: memref<16xi32, #tpu.memory_space<smem>>, %arg2: memref<1xi32, #tpu.memory_space<smem>>) -> (i32, i32) {
    %c0_i32 = arith.constant 0 : i32
    %c0_i32_0 = arith.constant 0 : i32
    %c0_i32_1 = arith.constant 0 : i32
    return %c0_i32, %c0_i32_0 : i32, i32
  }
  func.func @transform_5(%arg0: i32, %arg1: memref<16xi32, #tpu.memory_space<smem>>, %arg2: memref<1xi32, #tpu.memory_space<smem>>) -> (i32, i32) {
    %c0_i32 = arith.constant 0 : i32
    %c0_i32_0 = arith.constant 0 : i32
    %c0_i32_1 = arith.constant 0 : i32
    return %c0_i32, %c0_i32_0 : i32, i32
  }
  func.func @transform_6(%arg0: i32, %arg1: memref<16xi32, #tpu.memory_space<smem>>, %arg2: memref<1xi32, #tpu.memory_space<smem>>) -> (i32, i32) {
    %c0_i32 = arith.constant 0 : i32
    %c0_i32_0 = arith.constant 0 : i32
    return %arg0, %c0_i32 : i32, i32
  }
}

</mosaic_0001>

<bundles_post_ra>
// kernel: tpu_custom_call.1
= control target key start
LH: loop header
LB: loop body
LE: loop exit
PB: predicated region body
PF: predicated region fallthrough
CT: control target
= control target key end

     0   :  { %s1486_s10 = smov [#allocation5]   ;;  %s2075_s0 = inlined_call_operand.vmem [shape: s32[16], index: 0, kind: input, shape index: {}]   ;;  %s2076_s1 = inlined_call_operand.<no memory space> [shape: s32[1], index: 1, kind: input, shape index: {}]   ;;  %s2077_s2 = inlined_call_operand.hbm [shape: f32[100,128], index: 2, kind: input, shape index: {}]   ;;  %s2078_s3 = inlined_call_operand.hbm [shape: f32[64,128], index: 3, kind: input, shape index: {}]   ;;  %s2079_s4 = inlined_call_operand.vmem [shape: f32[2,128], index: 4, kind: input, shape index: {}]   ;;  %s2080_s5 = inlined_call_operand.vmem [shape: s32[16,1], index: 5, kind: input, shape index: {}]   ;;  %s2081_s6 = inlined_call_operand.vmem [shape: f32[1,128], index: 6, kind: input, shape index: {}]   ;;  %s2082_s7 = inlined_call_operand.vmem [shape: f32[1,128], index: 7, kind: input, shape index: {}]   ;;  %s2083_s8 = inlined_call_operand.hbm [shape: f32[16,128], index: 8, kind: output, shape index: {}]  }
   0x1   :  { %2107 = sst [smem:[#allocation65_spill]] %s2078_s3  ;;  %s14_s29 = sshll.u32 %s2075_s0, 4  ;;  %s15_s29 = int_to_ptr.vmem [resolvable:$true] %s14_s29 }
   0x2   :  { %2108 = sst [smem:[#allocation66_spill]] %s2080_s5 }
   0x3   :  { %18 = sst [smem:[#allocation6]] %s2076_s1 }
   0x4   :  { %17 = dma.vmem_to_smem %s15_s29, 16, %s1486_s10, [#allocation4] }
   0x5   :  { %1458 = dma.done.wait [#allocation4], 16 }
   0x6   :  { %1459 = vsyncadd [#allocation4], 4294967280 }
   0x7   :  { %21 = sfence }
   0x8   :  { %22 = vsyncpa [#allocation8], 0 }
   0x9   :  { %23 = vsyncpa [#allocation9], 0 }
   0xa   :  { %25 = vsyncpa [#allocation9 + $0x1], 0  ;;  %s1552_s11 = smov 0   ;;  %s1554_s12 = smov 0  }
   0xb   :  { %s1556_s13 = smov 0   ;;  %s1558_s0 = smov 0  }
   0xc LB: > { %2109 = sst [smem:[#allocation57_spill]] %s1472_s11  ;;  %s1573_s1 = sadd.s32 4294967295, %s1484_s0   ;;  %s1484_s0 = sphi %s1558_s0, %s2161_s0   ;;  %s1480_s13 = sphi %s1556_s13, %s2163_s13   ;;  %s1476_s12 = sphi %s1554_s12, %s2165_s12   ;;  %s1472_s11 = sphi %s1552_s11, %s2164_s11  }
   0xd   : > { %2110 = sst [smem:[#allocation58_spill]] %s1480_s13  ;;  %s772_s14 = sadd.s32 4294967294, %s1484_s0  }
   0xe   : > { %2111 = sst [smem:[#allocation59_spill]] %s1484_s0  ;;  %s1577_s15 = sadd.s32 1, %s1484_s0  }
   0xf   : > { %2112 = sst [smem:[#allocation60_spill]] %s1577_s15  ;;  %s148_s16 = sadd.s32 1, %s1480_s13 }
  0x10   : > { %s145_s17 = ssub.s32 %s1484_s0, %s1577_s15  ;;  %p158_p0 = scmp.ne.s32.totalorder %s1480_s13, %s1476_s12 }
  0x11   : > { %p146_p1 = scmp.eq.s32.totalorder %s145_s17, 0  ;;  %p159_p2 = scmp.eq.s32.totalorder %s1573_s1, 1 }
  0x12   : > { %p164_p3 = scmp.ne.s32.totalorder %s1476_s12, %s1472_s11  ;;  %p165_p4 = scmp.eq.s32.totalorder %s772_s14, 1 }
  0x13   : > { %s1588_s18 = scalar_select %p146_p1, %s1480_s13, %s148_s16  }
  0x14   : > { %p1590_p5 = por %p159_p2, %p158_p0  ;;  %p1594_p6 = por %p165_p4, %p164_p3 }
  0x15   : > { %2113 = sst [smem:[#allocation61_spill]] %s1588_s18  ;;  %p773_p7 = scmp.ge.s32.totalorder %s1484_s0, 1 }
  0x16   : > { %s2115_s20 = scalar_select %p1594_p6, 1, 0 }
  0x17   : > { %p172_p8 = scmp.lt.s32.totalorder %s1484_s0, 3  ;;  %p858_p9 = scmp.eq.s32.totalorder %s1573_s1, 0 }
  0x18   : > { %2116 = sst [smem:[#allocation62_spill]] %s2115_s20  ;;  %s1487_s24 = smov [#allocation7]  }
  0x19   : > { %p173_p10 = pnand %p773_p7, %p172_p8  ;;  %s2117_s3 = sld [smem:[#allocation65_spill]] }
  0x1a   : > { %s185_s25 = sshll.u32 %s1487_s24, 4  ;;  %s1488_s26 = smov 128   ;;  %s186_s25 = int_to_ptr.vmem [resolvable:$true] %s185_s25 }
  0x1b   : > { %p850_p11 = pneg %p173_p10  ;;  %s1489_s27 = smov 8  }
  0x1c   : > { %217 = sbr.rel (%p173_p10) target bundleno = 821 (0x335), region = 40 }
  0x1d   : > { %p851_p12 = pnand %p858_p9, %p850_p11 }
  0x1f   : > { %s183_s23 = sshll.u32 %s2117_s3, 4  ;;  %s184_s23 = int_to_ptr.hbm [resolvable:$true] %s183_s23 }
  0x20   : > { %853 = dma.hbm_to_vmem [thread:$0]  (!%p851_p12), %s184_s23, 1024, %s186_s25, [#allocation8], %s1488_s26, %s1488_s26, %s1489_s27  }
  0x21   : > { %1461 = dma.done.wait (%p858_p9), [#allocation8], 1024  }
  0x22   : > { %1463 = vsyncadd (%p858_p9), [#allocation8], 4294966272  ;;  %s2084_s28 = sand.u32 1, %s1476_s12   ;;  %p245_p13 = scmp.lt.s32.totalorder %s1573_s1, 1 }
  0x23   : > { %s1614_s29 = sshll.u32 %s2084_s28, 3  ;;  %s265_s30 = sld [smem:[#allocation5]] }
  0x24   : > { %s246_s9 = scalar_select %p245_p13, %s1573_s1, 1 }
  0x25   : > { %s2085_s10 = smov [#allocation2]   ;;  %s784_s16 = sld [smem:[#allocation5 + $0x1]] }
  0x26   : > { %s276_s14 = sshll.u32 %s2085_s10, 4  ;;  %s779_s17 = sshll.u32 %s246_s9, 3  ;;  %s277_s14 = int_to_ptr.vmem [resolvable:$true] %s276_s14 }
  0x27   : > { %s2118_s5 = sld [smem:[#allocation66_spill]]  ;;  %s1491_s27 = smov [#allocation2 + $0x1]  }
  0x28   : > { %s1626_s28 = sshll.u32 %s1491_s27, 4  ;;  %s1629_s10 = sld [smem:[#allocation5 + $0x2]] }
  0x29   : > { %s266_s26 = scalar_lea.hbm %s2077_s2, %s265_s30  ;;  %2119 = sst [smem:[#allocation63_spill]] %s1626_s28 }
  0x2a   : > { %s274_s3 = sshll.u32 %s266_s26, 4  ;;  %s1636_s30 = scalar_lea.hbm %s2077_s2, 104  ;;  %s275_s3 = int_to_ptr.hbm [resolvable:$true] %s274_s3 }
  0x2b   : > { %s966_s9 = sshra.s32 %s275_s3, 4  ;;  %s967_s9 = int_to_ptr.hbm [resolvable:$true] %s966_s9 }
  0x2c   : > { %s968_s18 = scalar_lea.hbm %s967_s9, 1  ;;  %p973_p3 = scmp.lt.s32.totalorder %s967_s9, %s2077_s2 }
  0x2d   : > { %s1621_s23 = scalar_lea.vmem %s2118_s5, %s779_s17  ;;  %p969_p0 = scmp.ne.s32.totalorder %s967_s9, %s968_s18 }
  0x2e   : > { %p974_p4 = scmp.lt.s32.totalorder %s1636_s30, %s968_s18 }
  0x2f   : > { %p970_p1 = pnand %p969_p0, %p858_p9 }
  0x30   : > { %p975_p7 = por %p974_p4, %p973_p3 }
  0x31   : > { %p971_p2 = pneg %p970_p1 }
  0x33   : > { %p976_p8 = pnand %p975_p7, %p971_p2 }
  0x35   : > { %979 = shalt.err (!%p976_p8)  }
  0x36   : > { %815 = dma.hbm_to_vmem [thread:$0]  (%p858_p9), %s275_s3, 16, %s277_s14, [#allocation3] }
  0x37   : > { %s281_s27 = scalar_lea.hbm %s2077_s2, %s784_s16  ;;  %s1492_s21 = smov [#allocation2 + $0x2]  }
  0x38   : > { %s290_s17 = sshll.u32 %s281_s27, 4  ;;  %s1647_s28 = sshll.u32 %s1492_s21, 4  ;;  %s291_s17 = int_to_ptr.hbm [resolvable:$true] %s290_s17 }
  0x39   : > { %2120 = sst [smem:[#allocation64_spill]] %s1647_s28  ;;  %s994_s18 = sshra.s32 %s291_s17, 4  ;;  %s995_s18 = int_to_ptr.hbm [resolvable:$true] %s994_s18 }
  0x3a   : > { %s996_s9 = scalar_lea.hbm %s995_s18, 1  ;;  %p1001_p13 = scmp.lt.s32.totalorder %s995_s18, %s2077_s2 }
  0x3b   : > { %p997_p10 = scmp.ne.s32.totalorder %s995_s18, %s996_s9  ;;  %p1002_p0 = scmp.lt.s32.totalorder %s1636_s30, %s996_s9 }
  0x3d   : > { %p998_p11 = pnand %p997_p10, %p858_p9  ;;  %p1003_p1 = por %p1002_p0, %p1001_p13 }
  0x3f   : > { %p999_p12 = pneg %p998_p11 }
  0x41   : > { %p1004_p2 = pnand %p1003_p1, %p999_p12 }
  0x43   : > { %1007 = shalt.err (!%p1004_p2)  }
  0x44   : > { %s2121_s14 = sld [smem:[#allocation63_spill]]  ;;  %s297_s26 = scalar_lea.hbm %s2077_s2, %s1629_s10 }
  0x45   : > { %s786_s27 = sld [smem:[#allocation5 + $0x3]]  ;;  %s306_s21 = sshll.u32 %s297_s26, 4  ;;  %s307_s21 = int_to_ptr.hbm [resolvable:$true] %s306_s21 }
  0x46   : > { %s1493_s18 = smov [#allocation2 + $0x3]   ;;  %s1022_s22 = sshra.s32 %s307_s21, 4  ;;  %s1023_s22 = int_to_ptr.hbm [resolvable:$true] %s1022_s22 }
  0x47   : > { %s1664_s9 = sshll.u32 %s1493_s18, 4  ;;  %s1024_s3 = scalar_lea.hbm %s1023_s22, 1  ;;  %s325_s9 = int_to_ptr.vmem [resolvable:$true] %s1664_s9 }
  0x48   : > { %p1025_p3 = scmp.ne.s32.totalorder %s1023_s22, %s1024_s3  ;;  %p1029_p8 = scmp.lt.s32.totalorder %s1023_s22, %s2077_s2 }
  0x49   : > { %p1030_p10 = scmp.lt.s32.totalorder %s1636_s30, %s1024_s3 }
  0x4a   : > { %s2122_s16 = int_to_ptr.vmem [resolvable:$true] %s2121_s14  ;;  %p1026_p4 = pnand %p1025_p3, %p858_p9 }
  0x4b   : > { %816 = dma.hbm_to_vmem [thread:$0]  (%p858_p9), %s291_s17, 16, %s2122_s16, [#allocation3] }
  0x4c   : > { %p1027_p7 = pneg %p1026_p4  ;;  %p1031_p11 = por %p1030_p10, %p1029_p8 }
  0x4e   : > { %p1032_p12 = pnand %p1031_p11, %p1027_p7 }
  0x50   : > { %1035 = shalt.err (!%p1032_p12)  }
  0x51   : > { %s2123_s10 = sld [smem:[#allocation64_spill]]  ;;  %s313_s28 = scalar_lea.hbm %s2077_s2, %s786_s27 }
  0x52   : > { %s787_s16 = sld [smem:[#allocation5 + $0x4]]  ;;  %s1494_s18 = smov [#allocation2 + $0x4]  }
  0x53   : > { %s788_s24 = sld [smem:[#allocation5 + $0x5]]  ;;  %s1680_s22 = sshll.u32 %s1494_s18, 4 }
  0x54   : > { %2125 = sst [smem:[#allocation63_spill]] %s1680_s22  ;;  %s322_s3 = sshll.u32 %s313_s28, 4  ;;  %s323_s3 = int_to_ptr.hbm [resolvable:$true] %s322_s3 }
  0x55   : > { %s1050_s14 = sshra.s32 %s323_s3, 4  ;;  %s1051_s14 = int_to_ptr.hbm [resolvable:$true] %s1050_s14 }
  0x56   : > { %p1057_p2 = scmp.lt.s32.totalorder %s1051_s14, %s2077_s2 }
  0x57   : > { %s2124_s17 = int_to_ptr.vmem [resolvable:$true] %s2123_s10  ;;  %s1052_s10 = scalar_lea.hbm %s1051_s14, 1 }
  0x58   : > { %817 = dma.hbm_to_vmem [thread:$0]  (%p858_p9), %s307_s21, 16, %s2124_s17, [#allocation3] }
  0x59   : > { %p1053_p13 = scmp.ne.s32.totalorder %s1051_s14, %s1052_s10  ;;  %p1058_p3 = scmp.lt.s32.totalorder %s1636_s30, %s1052_s10 }
  0x5b   : > { %p1054_p0 = pnand %p1053_p13, %p858_p9  ;;  %p1059_p4 = por %p1058_p3, %p1057_p2 }
  0x5d   : > { %p1055_p1 = pneg %p1054_p0 }
  0x5f   : > { %p1060_p7 = pnand %p1059_p4, %p1055_p1 }
  0x61   : > { %1063 = shalt.err (!%p1060_p7)  }
  0x62   : > { %818 = dma.hbm_to_vmem [thread:$0]  (%p858_p9), %s323_s3, 16, %s325_s9, [#allocation3] }
  0x63   : > { %s329_s26 = scalar_lea.hbm %s2077_s2, %s787_s16  ;;  %s1495_s28 = smov [#allocation2 + $0x5]  }
  0x64   : > { %s1694_s18 = sshll.u32 %s1495_s28, 4  ;;  %s338_s22 = sshll.u32 %s329_s26, 4  ;;  %s339_s22 = int_to_ptr.hbm [resolvable:$true] %s338_s22  ;;  %s357_s18 = int_to_ptr.vmem [resolvable:$true] %s1694_s18 }
  0x65   : > { %s345_s14 = scalar_lea.hbm %s2077_s2, %s788_s24  ;;  %s1078_s17 = sshra.s32 %s339_s22, 4  ;;  %s1079_s17 = int_to_ptr.hbm [resolvable:$true] %s1078_s17 }
  0x66   : > { %s354_s10 = sshll.u32 %s345_s14, 4  ;;  %s1080_s13 = scalar_lea.hbm %s1079_s17, 1  ;;  %s355_s10 = int_to_ptr.hbm [resolvable:$true] %s354_s10 }
  0x67   : > { %p1081_p8 = scmp.ne.s32.totalorder %s1079_s17, %s1080_s13  ;;  %p1085_p12 = scmp.lt.s32.totalorder %s1079_s17, %s2077_s2 }
  0x68   : > { %p1086_p13 = scmp.lt.s32.totalorder %s1636_s30, %s1080_s13 }
  0x69   : > { %p1082_p10 = pnand %p1081_p8, %p858_p9 }
  0x6a   : > { %p1087_p0 = por %p1086_p13, %p1085_p12 }
  0x6b   : > { %p1083_p11 = pneg %p1082_p10 }
  0x6d   : > { %p1088_p1 = pnand %p1087_p0, %p1083_p11 }
  0x6f   : > { %1091 = shalt.err (!%p1088_p1)  }
  0x70   : > { %s2126_s5 = sld [smem:[#allocation63_spill]]  ;;  %s1106_s24 = sshra.s32 %s355_s10, 4  ;;  %s1107_s24 = int_to_ptr.hbm [resolvable:$true] %s1106_s24 }
  0x71   : > { %s1108_s27 = scalar_lea.hbm %s1107_s24, 1  ;;  %p1113_p7 = scmp.lt.s32.totalorder %s1107_s24, %s2077_s2 }
  0x72   : > { %p1109_p2 = scmp.ne.s32.totalorder %s1107_s24, %s1108_s27  ;;  %p1114_p8 = scmp.lt.s32.totalorder %s1636_s30, %s1108_s27 }
  0x74   : > { %p1110_p3 = pnand %p1109_p2, %p858_p9  ;;  %p1115_p10 = por %p1114_p8, %p1113_p7 }
  0x76   : > { %s2127_s16 = int_to_ptr.vmem [resolvable:$true] %s2126_s5  ;;  %p1111_p4 = pneg %p1110_p3 }
  0x77   : > { %819 = dma.hbm_to_vmem [thread:$0]  (%p858_p9), %s339_s22, 16, %s2127_s16, [#allocation3] }
  0x78   : > { %p1116_p11 = pnand %p1115_p10, %p1111_p4 }
  0x7a   : > { %1119 = shalt.err (!%p1116_p11)  }
  0x7b   : > { %820 = dma.hbm_to_vmem [thread:$0]  (%p858_p9), %s355_s10, 16, %s357_s18, [#allocation3] }
  0x7c   : > { %s789_s22 = sld [smem:[#allocation5 + $0x6]]  ;;  %s1496_s26 = smov [#allocation2 + $0x6]  }
  0x7d   : > { %s372_s28 = sshll.u32 %s1496_s26, 4  ;;  %s790_s21 = sld [smem:[#allocation5 + $0x7]]  ;;  %s373_s28 = int_to_ptr.vmem [resolvable:$true] %s372_s28 }
  0x7e   : > { %s1497_s14 = smov [#allocation2 + $0x7]   ;;  %p249_p12 = scmp.lt.s32.totalorder %s1573_s1, 0 }
  0x7f   : > { %s1718_s17 = sshll.u32 %s1497_s14, 4  ;;  %s250_s9 = ssub.s32 0, %s1573_s1 }
  0x80   : > { %2128 = sst [smem:[#allocation64_spill]] %s1718_s17  ;;  %s1724_s3 = smin.u32 %s1573_s1, %s250_s9 }
  0x81   : > { %s252_s24 = sand.u32 1, %s1724_s3  }
  0x82   : > { %s361_s10 = scalar_lea.hbm %s2077_s2, %s789_s22 }
  0x83   : > { %s370_s27 = sshll.u32 %s361_s10, 4  ;;  %s377_s26 = scalar_lea.hbm %s2077_s2, %s790_s21  ;;  %s371_s27 = int_to_ptr.hbm [resolvable:$true] %s370_s27 }
  0x84   : > { %s386_s14 = sshll.u32 %s377_s26, 4  ;;  %s1134_s15 = sshra.s32 %s371_s27, 4  ;;  %s1135_s15 = int_to_ptr.hbm [resolvable:$true] %s1134_s15  ;;  %s387_s14 = int_to_ptr.hbm [resolvable:$true] %s386_s14 }
  0x85   : > { %s1136_s17 = scalar_lea.hbm %s1135_s15, 1  ;;  %p1141_p2 = scmp.lt.s32.totalorder %s1135_s15, %s2077_s2 }
  0x86   : > { %p1137_p13 = scmp.ne.s32.totalorder %s1135_s15, %s1136_s17  ;;  %p1142_p3 = scmp.lt.s32.totalorder %s1636_s30, %s1136_s17 }
  0x88   : > { %p1138_p0 = pnand %p1137_p13, %p858_p9  ;;  %p1143_p4 = por %p1142_p3, %p1141_p2 }
  0x8a   : > { %p1139_p1 = pneg %p1138_p0 }
  0x8c   : > { %p1144_p7 = pnand %p1143_p4, %p1139_p1 }
  0x8e   : > { %1147 = shalt.err (!%p1144_p7)  }
  0x8f   : > { %821 = dma.hbm_to_vmem [thread:$0]  (%p858_p9), %s371_s27, 16, %s373_s28, [#allocation3] }
  0x90   : > { %s253_s22 = ssub.s32 0, %s252_s24  ;;  %s1162_s21 = sshra.s32 %s387_s14, 4  ;;  %s1163_s21 = int_to_ptr.hbm [resolvable:$true] %s1162_s21 }
  0x91   : > { %s1164_s16 = scalar_lea.hbm %s1163_s21, 1  ;;  %p1169_p13 = scmp.lt.s32.totalorder %s1163_s21, %s2077_s2 }
  0x92   : > { %p1165_p8 = scmp.ne.s32.totalorder %s1163_s21, %s1164_s16  ;;  %p1170_p0 = scmp.lt.s32.totalorder %s1636_s30, %s1164_s16 }
  0x94   : > { %p1166_p10 = pnand %p1165_p8, %p858_p9  ;;  %p1171_p1 = por %p1170_p0, %p1169_p13 }
  0x96   : > { %p1167_p11 = pneg %p1166_p10 }
  0x98   : > { %p1172_p2 = pnand %p1171_p1, %p1167_p11 }
  0x9a   : > { %1175 = shalt.err (!%p1172_p2)  }
  0x9b   : > { %s2129_s28 = sld [smem:[#allocation64_spill]]  ;;  %s2167_s22 = smov (!%p249_p12, %s253_s22), %s252_s24 }
  0x9c   : > { %p782_p3 = scmp.lt.s32.totalorder %s2167_s22, 0  ;;  %s259_s18 = sadd.s32 2, %s2167_s22 }
  0x9d   : > { %s2131_s10 = sadd.s32 1, %s1573_s1  ;;  %s2093_s13 = sshll.u32 %s1573_s1, 3 }
  0x9e   : > { %p1760_p4 = scmp.lt.s32.totalorder %s2131_s10, 2  ;;  %s2169_s18 = smov (!%p782_p3, %s259_s18), %s2167_s22 }
  0x9f   : > { %s1769_s25 = sadd.s32 8, %s2093_s13  ;;  %s397_s3 = ssub.s32 1, %s2169_s18 }
  0xa0   : > { %s824_s24 = scalar_select %p1760_p4, [#allocation5], [#allocation45] }
  0xa1   : > { %s2130_s5 = int_to_ptr.vmem [resolvable:$true] %s2129_s28  ;;  %s417_s16 = sadd.s32 1, %s1769_s25 }
  0xa2   : > { %822 = dma.hbm_to_vmem [thread:$0]  (%p858_p9), %s387_s14, 16, %s2130_s5, [#allocation3] }
  0xa3   : > { %s825_s26 = scalar_select %p1760_p4, %s1769_s25, 0 }
  0xa4   : > { %s793_s14 = sshll.u32 %s397_s3, 3  ;;  %s2171_s16 = smov (!%p1760_p4, %s417_s16), 0 }
  0xa5   : > { %s399_s9 = sld [smem:[%s824_s24 + %s825_s26]]  ;;  %s1777_s21 = scalar_lea.vmem [#allocation2], %s793_s14 }
  0xa6   : > { %s413_s22 = sshll.u32 %s1777_s21, 4  ;;  %s705_s15 = scalar_lea.vmem %s1777_s21, 1 [#allocation2]  ;;  %s1781_s22 = int_to_ptr.vmem [resolvable:$true] %s413_s22 }
  0xa7   : > { %s827_s17 = scalar_select %p1760_p4, [#allocation5], [#allocation46] }
  0xa8   : > { %s1788_s28 = sshll.u32 %s705_s15, 4  ;;  %s709_s20 = scalar_lea.vmem %s1777_s21, 2 [#allocation2] }
  0xa9   : > { %2133 = sst [smem:[#allocation63_spill]] %s1788_s28  ;;  %s1801_s11 = scalar_lea.sflag [#allocation3], %s397_s3 }
  0xaa   : > { %s1794_s14 = sld [smem:[%s827_s17 + %s2171_s16]] }
  0xab   : > { %s400_s26 = scalar_lea.hbm %s2077_s2, %s399_s9 }
  0xac   : > { %s1796_s13 = sshll.u32 %s400_s26, 4  ;;  %s412_s13 = int_to_ptr.hbm [resolvable:$true] %s1796_s13 }
  0xad   : > { %s1190_s0 = sshra.s32 %s412_s13, 4  ;;  %s1191_s0 = int_to_ptr.hbm [resolvable:$true] %s1190_s0 }
  0xae   : > { %s1192_s15 = scalar_lea.hbm %s1191_s0, 1  ;;  %p1197_p8 = scmp.lt.s32.totalorder %s1191_s0, %s2077_s2 }
  0xaf   : > { %p1193_p9 = scmp.ne.s32.totalorder %s1191_s0, %s1192_s15  ;;  %p1198_p10 = scmp.lt.s32.totalorder %s1636_s30, %s1192_s15 }
  0xb1   : > { %p1194_p12 = pnand %p1193_p9, %p1760_p4  ;;  %p1199_p11 = por %p1198_p10, %p1197_p8 }
  0xb3   : > { %p1195_p7 = pneg %p1194_p12 }
  0xb5   : > { %p1200_p13 = pnand %p1199_p11, %p1195_p7 }
  0xb7   : > { %1203 = shalt.err (!%p1200_p13)  }
  0xb8   : > { %s1204_s9 = sshra.s32 %s1781_s22, 4  ;;  %s2134_s16 = smov [#allocation2]   ;;  %s1205_s9 = int_to_ptr.vmem [resolvable:$true] %s1204_s9 }
  0xb9   : > { %s1206_s3 = scalar_lea.vmem %s1205_s9, 1  ;;  %s1813_s17 = scalar_lea.vmem %s2134_s16, 16 }
  0xba   : > { %p1207_p0 = scmp.ne.s32.totalorder %s1205_s9, %s1206_s3  ;;  %p1211_p3 = scmp.lt.s32.totalorder %s1205_s9, [#allocation2] }
  0xbb   : > { %p1212_p9 = scmp.lt.s32.totalorder %s1813_s17, %s1206_s3 }
  0xbc   : > { %p1208_p1 = pnand %p1207_p0, %p1760_p4 }
  0xbd   : > { %p1213_p12 = por %p1212_p9, %p1211_p3 }
  0xbe   : > { %p1209_p2 = pneg %p1208_p1 }
  0xc0   : > { %p1214_p6 = pnand %p1213_p12, %p1209_p2 }
  0xc2   : > { %1217 = shalt.err (!%p1214_p6)  }
  0xc3   : > { %826 = dma.hbm_to_vmem [thread:$0]  (%p1760_p4), %s412_s13, 16, %s1781_s22, %s1801_s11 }
  0xc4   : > { %s830_s0 = scalar_select %p1760_p4, [#allocation5], [#allocation47] }
  0xc5   : > { %s2135_s5 = sadd.s32 2, %s1769_s25  ;;  %s419_s15 = scalar_lea.hbm %s2077_s2, %s1794_s14 }
  0xc6   : > { %s2173_s5 = smov (!%p1760_p4, %s2135_s5), 0  ;;  %s1832_s10 = sshll.u32 %s709_s20, 4 }
  0xc7   : > { %2136 = sst [smem:[#allocation64_spill]] %s1832_s10  ;;  %s429_s9 = sshll.u32 %s419_s15, 4  ;;  %s430_s9 = int_to_ptr.hbm [resolvable:$true] %s429_s9 }
  0xc8   : > { %s1834_s3 = sld [smem:[%s830_s0 + %s2173_s5]]  ;;  %s1218_s13 = sshra.s32 %s430_s9, 4  ;;  %s1219_s13 = int_to_ptr.hbm [resolvable:$true] %s1218_s13 }
  0xc9   : > { %s1220_s22 = scalar_lea.hbm %s1219_s13, 1  ;;  %p1225_p10 = scmp.lt.s32.totalorder %s1219_s13, %s2077_s2 }
  0xca   : > { %p1221_p6 = scmp.ne.s32.totalorder %s1219_s13, %s1220_s22  ;;  %p1226_p11 = scmp.lt.s32.totalorder %s1636_s30, %s1220_s22 }
  0xcc   : > { %p1222_p7 = pnand %p1221_p6, %p1760_p4  ;;  %p1227_p13 = por %p1226_p11, %p1225_p10 }
  0xce   : > { %p1223_p8 = pneg %p1222_p7 }
  0xd0   : > { %p1228_p0 = pnand %p1227_p13, %p1223_p8 }
  0xd2   : > { %1231 = shalt.err (!%p1228_p0)  }
  0xd3   : > { %s2137_s20 = sld [smem:[#allocation63_spill]] }
  0xd9   : > { %s2138_s14 = int_to_ptr.vmem [resolvable:$true] %s2137_s20 }
  0xda   : > { %s1232_s0 = sshra.s32 %s2138_s14, 4  ;;  %s1233_s0 = int_to_ptr.vmem [resolvable:$true] %s1232_s0 }
  0xdb   : > { %s1234_s5 = scalar_lea.vmem %s1233_s0, 1  ;;  %p1239_p9 = scmp.lt.s32.totalorder %s1233_s0, [#allocation2] }
  0xdc   : > { %p1235_p1 = scmp.ne.s32.totalorder %s1233_s0, %s1234_s5  ;;  %p1240_p12 = scmp.lt.s32.totalorder %s1813_s17, %s1234_s5 }
  0xde   : > { %p1236_p2 = pnand %p1235_p1, %p1760_p4  ;;  %p1241_p6 = por %p1240_p12, %p1239_p9 }
  0xe0   : > { %p1237_p3 = pneg %p1236_p2 }
  0xe2   : > { %p1242_p7 = pnand %p1241_p6, %p1237_p3 }
  0xe4   : > { %1245 = shalt.err (!%p1242_p7)  }
  0xe5   : > { %s2139_s28 = smov %s2138_s14  ;;  %s453_s24 = sadd.s32 3, %s1769_s25 }
  0xe6   : > { %829 = dma.hbm_to_vmem [thread:$0]  (%p1760_p4), %s430_s9, 16, %s2139_s28, %s1801_s11 }
  0xe7   : > { %s713_s26 = scalar_lea.vmem %s1777_s21, 3 [#allocation2]  ;;  %s2175_s24 = smov (!%p1760_p4, %s453_s24), 0 }
  0xe8   : > { %s833_s15 = scalar_select %p1760_p4, [#allocation5], [#allocation48] }
  0xe9   : > { %s437_s16 = scalar_lea.hbm %s2077_s2, %s1834_s3  ;;  %s1863_s14 = sshll.u32 %s713_s26, 4 }
  0xea   : > { %2140 = sst [smem:[#allocation63_spill]] %s1863_s14  ;;  %s447_s20 = sshll.u32 %s437_s16, 4  ;;  %s448_s20 = int_to_ptr.hbm [resolvable:$true] %s447_s20 }
  0xeb   : > { %s1865_s0 = sld [smem:[%s833_s15 + %s2175_s24]]  ;;  %s1246_s9 = sshra.s32 %s448_s20, 4  ;;  %s1247_s9 = int_to_ptr.hbm [resolvable:$true] %s1246_s9 }
  0xec   : > { %s1248_s5 = scalar_lea.hbm %s1247_s9, 1  ;;  %p1253_p13 = scmp.lt.s32.totalorder %s1247_s9, %s2077_s2 }
  0xed   : > { %p1249_p8 = scmp.ne.s32.totalorder %s1247_s9, %s1248_s5  ;;  %p1254_p0 = scmp.lt.s32.totalorder %s1636_s30, %s1248_s5 }
  0xef   : > { %p1250_p10 = pnand %p1249_p8, %p1760_p4  ;;  %p1255_p1 = por %p1254_p0, %p1253_p13 }
  0xf1   : > { %p1251_p11 = pneg %p1250_p10 }
  0xf3   : > { %p1256_p2 = pnand %p1255_p1, %p1251_p11 }
  0xf5   : > { %1259 = shalt.err (!%p1256_p2)  }
  0xf6   : > { %s2141_s3 = sld [smem:[#allocation64_spill]] }
  0xfc   : > { %s2142_s24 = int_to_ptr.vmem [resolvable:$true] %s2141_s3 }
  0xfd   : > { %s1260_s26 = sshra.s32 %s2142_s24, 4  ;;  %s1261_s26 = int_to_ptr.vmem [resolvable:$true] %s1260_s26 }
  0xfe   : > { %s1262_s15 = scalar_lea.vmem %s1261_s26, 1  ;;  %p1267_p6 = scmp.lt.s32.totalorder %s1261_s26, [#allocation2] }
  0xff   : > { %p1263_p3 = scmp.ne.s32.totalorder %s1261_s26, %s1262_s15  ;;  %p1268_p7 = scmp.lt.s32.totalorder %s1813_s17, %s1262_s15 }
 0x101   : > { %p1264_p9 = pnand %p1263_p3, %p1760_p4  ;;  %p1269_p8 = por %p1268_p7, %p1267_p6 }
 0x103   : > { %p1265_p12 = pneg %p1264_p9 }
 0x105   : > { %p1270_p10 = pnand %p1269_p8, %p1265_p12 }
 0x107   : > { %1273 = shalt.err (!%p1270_p10)  }
 0x108   : > { %s2143_s10 = smov %s2142_s24  ;;  %s471_s13 = sadd.s32 4, %s1769_s25 }
 0x109   : > { %832 = dma.hbm_to_vmem [thread:$0]  (%p1760_p4), %s448_s20, 16, %s2143_s10, %s1801_s11 }
 0x10a   : > { %s717_s22 = scalar_lea.vmem %s1777_s21, 4 [#allocation2]  ;;  %s2177_s13 = smov (!%p1760_p4, %s471_s13), 0 }
 0x10b   : > { %s836_s16 = scalar_select %p1760_p4, [#allocation5], [#allocation49] }
 0x10c   : > { %s455_s28 = scalar_lea.hbm %s2077_s2, %s1865_s0  ;;  %s1894_s24 = sshll.u32 %s717_s22, 4 }
 0x10d   : > { %2144 = sst [smem:[#allocation64_spill]] %s1894_s24  ;;  %s465_s3 = sshll.u32 %s455_s28, 4  ;;  %s466_s3 = int_to_ptr.hbm [resolvable:$true] %s465_s3 }
 0x10e   : > { %s1896_s26 = sld [smem:[%s836_s16 + %s2177_s13]]  ;;  %s1274_s20 = sshra.s32 %s466_s3, 4  ;;  %s1275_s20 = int_to_ptr.hbm [resolvable:$true] %s1274_s20 }
 0x10f   : > { %s1276_s15 = scalar_lea.hbm %s1275_s20, 1  ;;  %p1281_p1 = scmp.lt.s32.totalorder %s1275_s20, %s2077_s2 }
 0x110   : > { %p1277_p11 = scmp.ne.s32.totalorder %s1275_s20, %s1276_s15  ;;  %p1282_p2 = scmp.lt.s32.totalorder %s1636_s30, %s1276_s15 }
 0x112   : > { %p1278_p13 = pnand %p1277_p11, %p1760_p4  ;;  %p1283_p3 = por %p1282_p2, %p1281_p1 }
 0x114   : > { %p1279_p0 = pneg %p1278_p13 }
 0x116   : > { %p1284_p9 = pnand %p1283_p3, %p1279_p0 }
 0x118   : > { %1287 = shalt.err (!%p1284_p9)  }
 0x119   : > { %s2145_s0 = sld [smem:[#allocation63_spill]] }
 0x11f   : > { %s2146_s13 = int_to_ptr.vmem [resolvable:$true] %s2145_s0 }
 0x120   : > { %s1288_s22 = sshra.s32 %s2146_s13, 4  ;;  %s1289_s22 = int_to_ptr.vmem [resolvable:$true] %s1288_s22 }
 0x121   : > { %s1290_s16 = scalar_lea.vmem %s1289_s22, 1  ;;  %p1295_p8 = scmp.lt.s32.totalorder %s1289_s22, [#allocation2] }
 0x122   : > { %p1291_p12 = scmp.ne.s32.totalorder %s1289_s22, %s1290_s16  ;;  %p1296_p10 = scmp.lt.s32.totalorder %s1813_s17, %s1290_s16 }
 0x124   : > { %p1292_p6 = pnand %p1291_p12, %p1760_p4  ;;  %p1297_p11 = por %p1296_p10, %p1295_p8 }
 0x126   : > { %p1293_p7 = pneg %p1292_p6 }
 0x128   : > { %p1298_p13 = pnand %p1297_p11, %p1293_p7 }
 0x12a   : > { %1301 = shalt.err (!%p1298_p13)  }
 0x12b   : > { %s2147_s14 = smov %s2146_s13  ;;  %s489_s9 = sadd.s32 5, %s1769_s25 }
 0x12c   : > { %835 = dma.hbm_to_vmem [thread:$0]  (%p1760_p4), %s466_s3, 16, %s2147_s14, %s1801_s11 }
 0x12d   : > { %s721_s5 = scalar_lea.vmem %s1777_s21, 5 [#allocation2]  ;;  %s2179_s9 = smov (!%p1760_p4, %s489_s9), 0 }
 0x12e   : > { %s839_s28 = scalar_select %p1760_p4, [#allocation5], [#allocation50] }
 0x12f   : > { %s473_s10 = scalar_lea.hbm %s2077_s2, %s1896_s26  ;;  %s1925_s13 = sshll.u32 %s721_s5, 4 }
 0x130   : > { %2148 = sst [smem:[#allocation63_spill]] %s1925_s13  ;;  %s483_s0 = sshll.u32 %s473_s10, 4  ;;  %s484_s0 = int_to_ptr.hbm [resolvable:$true] %s483_s0 }
 0x131   : > { %s1927_s22 = sld [smem:[%s839_s28 + %s2179_s9]]  ;;  %s1302_s3 = sshra.s32 %s484_s0, 4  ;;  %s1303_s3 = int_to_ptr.hbm [resolvable:$true] %s1302_s3 }
 0x132   : > { %s1304_s16 = scalar_lea.hbm %s1303_s3, 1  ;;  %p1309_p3 = scmp.lt.s32.totalorder %s1303_s3, %s2077_s2 }
 0x133   : > { %p1305_p0 = scmp.ne.s32.totalorder %s1303_s3, %s1304_s16  ;;  %p1310_p9 = scmp.lt.s32.totalorder %s1636_s30, %s1304_s16 }
 0x135   : > { %p1306_p1 = pnand %p1305_p0, %p1760_p4  ;;  %p1311_p12 = por %p1310_p9, %p1309_p3 }
 0x137   : > { %p1307_p2 = pneg %p1306_p1 }
 0x139   : > { %p1312_p6 = pnand %p1311_p12, %p1307_p2 }
 0x13b   : > { %1315 = shalt.err (!%p1312_p6)  }
 0x13c   : > { %s2149_s26 = sld [smem:[#allocation64_spill]] }
 0x142   : > { %s2150_s9 = int_to_ptr.vmem [resolvable:$true] %s2149_s26 }
 0x143   : > { %s1316_s5 = sshra.s32 %s2150_s9, 4  ;;  %s1317_s5 = int_to_ptr.vmem [resolvable:$true] %s1316_s5 }
 0x144   : > { %s1318_s28 = scalar_lea.vmem %s1317_s5, 1  ;;  %p1323_p11 = scmp.lt.s32.totalorder %s1317_s5, [#allocation2] }
 0x145   : > { %p1319_p7 = scmp.ne.s32.totalorder %s1317_s5, %s1318_s28  ;;  %p1324_p13 = scmp.lt.s32.totalorder %s1813_s17, %s1318_s28 }
 0x147   : > { %p1320_p8 = pnand %p1319_p7, %p1760_p4  ;;  %p1325_p0 = por %p1324_p13, %p1323_p11 }
 0x149   : > { %p1321_p10 = pneg %p1320_p8 }
 0x14b   : > { %p1326_p1 = pnand %p1325_p0, %p1321_p10 }
 0x14d   : > { %1329 = shalt.err (!%p1326_p1)  }
 0x14e   : > { %s2151_s24 = smov %s2150_s9  ;;  %s507_s20 = sadd.s32 6, %s1769_s25 }
 0x14f   : > { %838 = dma.hbm_to_vmem [thread:$0]  (%p1760_p4), %s484_s0, 16, %s2151_s24, %s1801_s11 }
 0x150   : > { %s725_s15 = scalar_lea.vmem %s1777_s21, 6 [#allocation2]  ;;  %s2181_s20 = smov (!%p1760_p4, %s507_s20), 0 }
 0x151   : > { %s842_s10 = scalar_select %p1760_p4, [#allocation5], [#allocation51] }
 0x152   : > { %s491_s14 = scalar_lea.hbm %s2077_s2, %s1927_s22  ;;  %s1956_s9 = sshll.u32 %s725_s15, 4  ;;  %s522_s9 = int_to_ptr.vmem [resolvable:$true] %s1956_s9 }
 0x153   : > { %s501_s26 = sshll.u32 %s491_s14, 4  ;;  %s1958_s5 = sld [smem:[%s842_s10 + %s2181_s20]]  ;;  %s502_s26 = int_to_ptr.hbm [resolvable:$true] %s501_s26 }
 0x154   : > { %s1330_s28 = sshra.s32 %s502_s26, 4  ;;  %s1331_s28 = int_to_ptr.hbm [resolvable:$true] %s1330_s28 }
 0x155   : > { %s1332_s0 = scalar_lea.hbm %s1331_s28, 1  ;;  %p1337_p12 = scmp.lt.s32.totalorder %s1331_s28, %s2077_s2 }
 0x156   : > { %p1333_p2 = scmp.ne.s32.totalorder %s1331_s28, %s1332_s0  ;;  %p1338_p6 = scmp.lt.s32.totalorder %s1636_s30, %s1332_s0 }
 0x158   : > { %p1334_p3 = pnand %p1333_p2, %p1760_p4  ;;  %p1339_p7 = por %p1338_p6, %p1337_p12 }
 0x15a   : > { %p1335_p9 = pneg %p1334_p3 }
 0x15c   : > { %p1340_p8 = pnand %p1339_p7, %p1335_p9 }
 0x15e   : > { %1343 = shalt.err (!%p1340_p8)  }
 0x15f   : > { %s2152_s22 = sld [smem:[#allocation63_spill]] }
 0x165   : > { %s2153_s15 = int_to_ptr.vmem [resolvable:$true] %s2152_s22 }
 0x166   : > { %s1344_s20 = sshra.s32 %s2153_s15, 4  ;;  %s1345_s20 = int_to_ptr.vmem [resolvable:$true] %s1344_s20 }
 0x167   : > { %s1346_s10 = scalar_lea.vmem %s1345_s20, 1  ;;  %p1351_p0 = scmp.lt.s32.totalorder %s1345_s20, [#allocation2] }
 0x168   : > { %p1347_p10 = scmp.ne.s32.totalorder %s1345_s20, %s1346_s10  ;;  %p1352_p1 = scmp.lt.s32.totalorder %s1813_s17, %s1346_s10 }
 0x16a   : > { %p1348_p11 = pnand %p1347_p10, %p1760_p4  ;;  %p1353_p2 = por %p1352_p1, %p1351_p0 }
 0x16c   : > { %p1349_p13 = pneg %p1348_p11 }
 0x16e   : > { %p1354_p3 = pnand %p1353_p2, %p1349_p13 }
 0x170   : > { %1357 = shalt.err (!%p1354_p3)  }
 0x171   : > { %s2154_s13 = smov %s2153_s15  ;;  %s525_s3 = sadd.s32 7, %s1769_s25 }
 0x172   : > { %841 = dma.hbm_to_vmem [thread:$0]  (%p1760_p4), %s502_s26, 16, %s2154_s13, %s1801_s11 }
 0x173   : > { %s845_s16 = scalar_select %p1760_p4, [#allocation5], [#allocation52] }
 0x174   : > { %s2183_s3 = smov (!%p1760_p4, %s525_s3), 0  ;;  %s509_s0 = scalar_lea.hbm %s2077_s2, %s1958_s5 }
 0x175   : > { %s729_s24 = scalar_lea.vmem %s1777_s21, 7 [#allocation2]  ;;  %s519_s22 = sshll.u32 %s509_s0, 4  ;;  %s520_s22 = int_to_ptr.hbm [resolvable:$true] %s519_s22 }
 0x176   : > { %s526_s15 = sld [smem:[%s845_s16 + %s2183_s3]]  ;;  %s1358_s20 = sshra.s32 %s520_s22, 4  ;;  %s1359_s20 = int_to_ptr.hbm [resolvable:$true] %s1358_s20 }
 0x177   : > { %s1360_s10 = scalar_lea.hbm %s1359_s20, 1  ;;  %p1365_p7 = scmp.lt.s32.totalorder %s1359_s20, %s2077_s2 }
 0x178   : > { %p1361_p9 = scmp.ne.s32.totalorder %s1359_s20, %s1360_s10  ;;  %p1366_p8 = scmp.lt.s32.totalorder %s1636_s30, %s1360_s10 }
 0x17a   : > { %p1362_p12 = pnand %p1361_p9, %p1760_p4  ;;  %p1367_p10 = por %p1366_p8, %p1365_p7 }
 0x17c   : > { %p1363_p6 = pneg %p1362_p12 }
 0x17e   : > { %p1368_p11 = pnand %p1367_p10, %p1363_p6 }
 0x180   : > { %1371 = shalt.err (!%p1368_p11)  }
 0x181   : > { %s1372_s21 = sshra.s32 %s522_s9, 4  ;;  %s1373_s21 = int_to_ptr.vmem [resolvable:$true] %s1372_s21 }
 0x182   : > { %s1374_s5 = scalar_lea.vmem %s1373_s21, 1  ;;  %p1379_p2 = scmp.lt.s32.totalorder %s1373_s21, [#allocation2] }
 0x183   : > { %p1375_p13 = scmp.ne.s32.totalorder %s1373_s21, %s1374_s5  ;;  %p1380_p3 = scmp.lt.s32.totalorder %s1813_s17, %s1374_s5 }
 0x185   : > { %p1376_p0 = pnand %p1375_p13, %p1760_p4  ;;  %p1381_p9 = por %p1380_p3, %p1379_p2 }
 0x187   : > { %p1377_p1 = pneg %p1376_p0 }
 0x189   : > { %p1382_p12 = pnand %p1381_p9, %p1377_p1 }
 0x18b   : > { %1385 = shalt.err (!%p1382_p12)  }
 0x18c   : > { %844 = dma.hbm_to_vmem [thread:$0]  (%p1760_p4), %s520_s22, 16, %s522_s9, %s1801_s11 }
 0x18d   : > { %s2003_s13 = sshll.u32 %s729_s24, 4  ;;  %s527_s14 = scalar_lea.hbm %s2077_s2, %s526_s15  ;;  %s540_s13 = int_to_ptr.vmem [resolvable:$true] %s2003_s13 }
 0x18e   : > { %s537_s28 = sshll.u32 %s527_s14, 4  ;;  %s538_s28 = int_to_ptr.hbm [resolvable:$true] %s537_s28 }
 0x18f   : > { %s1386_s0 = sshra.s32 %s538_s28, 4  ;;  %s1387_s0 = int_to_ptr.hbm [resolvable:$true] %s1386_s0 }
 0x190   : > { %s1388_s20 = scalar_lea.hbm %s1387_s0, 1  ;;  %p1393_p10 = scmp.lt.s32.totalorder %s1387_s0, %s2077_s2 }
 0x191   : > { %p1389_p6 = scmp.ne.s32.totalorder %s1387_s0, %s1388_s20  ;;  %p1394_p11 = scmp.lt.s32.totalorder %s1636_s30, %s1388_s20 }
 0x193   : > { %p1390_p7 = pnand %p1389_p6, %p1760_p4  ;;  %p1395_p13 = por %p1394_p11, %p1393_p10 }
 0x195   : > { %p1391_p8 = pneg %p1390_p7 }
 0x197   : > { %p1396_p0 = pnand %p1395_p13, %p1391_p8 }
 0x199   : > { %1399 = shalt.err (!%p1396_p0)  }
 0x19a   : > { %s1400_s9 = sshra.s32 %s540_s13, 4  ;;  %s1401_s9 = int_to_ptr.vmem [resolvable:$true] %s1400_s9 }
 0x19b   : > { %s1402_s24 = scalar_lea.vmem %s1401_s9, 1  ;;  %p1407_p9 = scmp.lt.s32.totalorder %s1401_s9, [#allocation2] }
 0x19c   : > { %p1403_p1 = scmp.ne.s32.totalorder %s1401_s9, %s1402_s24  ;;  %p1408_p12 = scmp.lt.s32.totalorder %s1813_s17, %s1402_s24 }
 0x19e   : > { %p1404_p2 = pnand %p1403_p1, %p1760_p4  ;;  %p1409_p6 = por %p1408_p12, %p1407_p9 }
 0x1a0   : > { %p1405_p3 = pneg %p1404_p2 }
 0x1a2   : > { %p1410_p7 = pnand %p1409_p6, %p1405_p3 }
 0x1a4   : > { %1413 = shalt.err (!%p1410_p7)  }
 0x1a5   : > { %847 = dma.hbm_to_vmem [thread:$0]  (%p1760_p4), %s538_s28, 16, %s540_s13, %s1801_s11 }
 0x1a6   : > { %s244_s30 = scalar_lea.vmem [#allocation10], %s1614_s29  ;;  %s543_s22 = scalar_lea.sflag [#allocation3], %s2169_s18 }
 0x1a7   : > { %1464 = dma.done.wait %s543_s22, 128 }
 0x1a8   : > { %1465 = vsyncadd %s543_s22, 4294967168  ;;  %v1498_v0 = vmov 0   ;;  %v567_v1 = vld [vmem:[%s1621_s23] sm:$0xff]  ;;  %v1499_v2 = vmov 0.0   ;;  %s563_s27 = sld [smem:[#allocation6]]  ;;  %s801_s17 = sshll.u32 %s2169_s18, 3 }
 0x1a9   : > { %910 = vset.pattern.permute.xlu0 %v1498_v0  ;;  %vm568_vm0 = vcmp.eq.s32.totalorder %v567_v1, 0  ;;  %vm579_vm1 = vcmp.eq.s32.totalorder %v567_v1, 1  ;;  %s561_s15 = scalar_lea.vmem [#allocation2], %s801_s17  ;;  %v916_v8 = vld [vmem:[%s2079_s4] ss:$0 sm:$0xff]  ;;  %v1500_v18 = vmov 128.0  }
 0x1aa   : > { %v569_v3 = vsel %vm568_vm0, 1.0, %v1499_v2  ;;  %v580_v4 = vsel %vm579_vm1, 1.0, %v1499_v2  ;;  %v562_v6 = vld [vmem:[%s561_s15] sm:$0xff]  ;;  %920 = vrcp.f32 %v1500_v18  ;;  %s2155_s3 = sshll.u32 %s1573_s1, 3  ;;  %s641_s10 = sshll.u32 %s244_s30, 4  ;;  %s642_s10 = int_to_ptr.vmem [resolvable:$true] %s641_s10 }
 0x1ab   : > { %v911_v5 = vpack.i.bf16 %v580_v4, %v569_v3  ;;  %v917_v13 = vld [vmem:[%s2079_s4 + $0x1] ss:$0 sm:$0xff]  ;;  %v918_v38 = vld [vmem:[%s2081_s6] ss:$0 sm:$0xff]  ;;  %s639_s28 = scalar_lea.hbm %s2083_s8, %s2155_s3  ;;  %s2156_s1 = sand.u32 1, %s1476_s12  }
 0x1ac   : > { %v919_v41 = vld [vmem:[%s2082_s7] ss:$0 sm:$0xff]  ;;  %s643_s25 = sshll.u32 %s639_s28, 4  ;;  %s629_s9 = scalar_lea.sflag [#allocation9], %s2156_s1  ;;  %s644_s25 = int_to_ptr.hbm [resolvable:$true] %s643_s25 }
 0x1ad   : > { %912 = vperm.xlu0 %910, %v911_v5   ;;  %s1428_s24 = sshra.s32 %s644_s25, 4  ;;  %s1434_s15 = scalar_lea.hbm %s2083_s8, 16  ;;  %s1429_s24 = int_to_ptr.hbm [resolvable:$true] %s1428_s24 }
 0x1ae   : > { %s564_s11 = scalar_lea.vmem [#allocation7], %s563_s27  ;;  %s1430_s22 = scalar_lea.hbm %s1429_s24, 8 }
 0x1af   : > { %v565_v7 = vld [vmem:[%s564_s11] sm:$0xff]  ;;  %p1431_p4 = scmp.ne.s32.totalorder %s1429_s24, %s1430_s22  ;;  %p1435_p11 = scmp.lt.s32.totalorder %s1429_s24, %s2083_s8 }
 0x1b0   : > { %v566_v12 = vadd.f32 %v565_v7, %v562_v6  ;;  %v921_v19 = vpop.eup %920  ;;  %p1436_p13 = scmp.lt.s32.totalorder %s1434_s15, %s1430_s22 }
 0x1b1   : > { %v593_v20 = vmul.f32 128.0, %v921_v19  ;;  %vm597_vm2 = vweird.f32 %v921_v19  ;;  %p1432_p8 = pnand %p1431_p4, %p1590_p5 }
 0x1b2   : > { %p1437_p0 = por %p1436_p13, %p1435_p11 }
 0x1b3   : > { %v594_v21 = vsub.f32 1.0, %v593_v20  ;;  %p1433_p10 = pneg %p1432_p8 }
 0x1b5   : > { %v595_v22 = vmul.f32 %v921_v19, %v594_v21  ;;  %p1438_p1 = pnand %p1437_p0, %p1433_p10 }
 0x1b7   : > { %v596_v23 = vadd.f32 %v921_v19, %v595_v22 }
 0x1b9   : > { %v598_v24 = vsel %vm597_vm2, %v921_v19, %v596_v23 }
 0x21f   : > { %v913_v9 = vpop.permute.xlu0 %912 }
 0x220   : > { %v915_v10 = vunpack.i.h.bf16 %v913_v9  ;;  %v914_v11 = vunpack.i.l.bf16 %v913_v9 }
 0x222   : > { %v577_v14 = vmul.f32 %v916_v8, %v914_v11  ;;  %v588_v16 = vmul.f32 %v917_v13, %v915_v10 }
 0x224   : > { %v578_v15 = vadd.f32 %v577_v14, %v566_v12 }
 0x226   : > { %v589_v17 = vadd.f32 %v588_v16, %v578_v15 }
 0x228   : > { %590 = vadd.xlane.f32.xlu0 %v589_v17 }
 0x29b   : > { %v591_v25 = vpop.xlane.xlu0 %590 }
 0x29c   : > { %v599_v26 = vmul.f32 %v598_v24, %v591_v25 }
 0x29e   : > { %v600_v27 = vsub.f32 %v589_v17, %v599_v26 }
 0x2a0   : > { %v601_v28 = vmul.f32 %v600_v27, %v600_v27 }
 0x2a2   : > { %602 = vadd.xlane.f32.xlu1 %v601_v28 }
 0x315   : > { %v603_v29 = vpop.xlane.xlu1 %602 }
 0x316   : > { %v604_v30 = vmul.f32 %v603_v29, %v598_v24 }
 0x318   : > { %v605_v31 = vadd.f32 1e-12, %v604_v30 }
 0x31a   : > { %922 = vrsqrt.f32 %v605_v31  ;;  %vm612_vm4 = vweird.f32 %v605_v31 }
 0x320   : > { %v923_v32 = vpop.eup %922 }
 0x321   : > { %v607_v33 = vmul.f32 %v923_v32, %v605_v31  ;;  %vm613_vm3 = vweird.f32 %v923_v32 }
 0x322   : > { %vm614_vm5 = vmor %vm612_vm4, %vm613_vm3 }
 0x323   : > { %v608_v34 = vmul.f32 %v923_v32, %v607_v33 }
 0x325   : > { %v609_v35 = vmul.f32 0.5, %v608_v34 }
 0x327   : > { %v610_v36 = vsub.f32 1.5, %v609_v35 }
 0x329   : > { %v611_v37 = vmul.f32 %v923_v32, %v610_v36 }
 0x32b   : > { %v615_v39 = vsel %vm614_vm5, %v923_v32, %v611_v37 }
 0x32c   : > { %v616_v40 = vmul.f32 %v615_v39, %v600_v27 }
 0x32e   : > { %v621_v42 = vmul.f32 %v918_v38, %v616_v40 }
 0x330   : > { %v626_v43 = vadd.f32 %v919_v41, %v621_v42 }
 0x332   : > { %627 = vst [vmem:[%s244_s30] sm:$0xff] %v626_v43 }
 0x333   : > { %1441 = shalt.err (!%p1438_p1)
}
 0x334   : > { %848 = dma.vmem_to_hbm [thread:$0]  (%p1590_p5), %s642_s10, 128, %s644_s25, %s629_s9  }
 0x335 PF: > { %s2157_s29 = sld [smem:[#allocation59_spill]] }
 0x336   : > { %s2158_s30 = sld [smem:[#allocation57_spill]] }
 0x337   : > { %s2159_s21 = sld [smem:[#allocation62_spill]] }
 0x33b   : > { %p862_p2 = scmp.ge.s32.totalorder %s2157_s29, 2 }
 0x33c   : > { %s655_s23 = sand.u32 1, %s2158_s30  }
 0x33d   : > { %p2160_p3 = scmp.ne.s32.totalorder %s2159_s21, 0  ;;  %s656_s5 = scalar_lea.sflag [#allocation9], %s655_s23 }
 0x33f   : > { %p855_p9 = pnand %p862_p2, %p2160_p3 }
 0x341   : > { %p856_p12 = pneg %p855_p9 }
 0x343   : > { %1467 = dma.done.wait (%p856_p12), %s656_s5, 128  }
 0x344   : > { %1469 = vsyncadd (%p856_p12), %s656_s5, 4294967168  ;;  %s2161_s0 = sld [smem:[#allocation60_spill]]  ;;  %s2164_s11 = smov %s1476_s12 }
 0x345   : > { %s2162_s18 = sld [smem:[#allocation58_spill]] }
 0x346   : > { %s2163_s13 = sld [smem:[#allocation61_spill]] }
 0x34a   : > { %p28_p6 = scmp.ge.s32.totalorder %s2161_s0, 4  }
 0x34b   : > { %s2165_s12 = smov %s2162_s18 }
 0x34c   :  { %30 = sbr.rel (!%p28_p6) target bundleno = 12 (0xc), region = 188 }
 0x351   :  { %662 = vsyncpa [#allocation8], 1 }
 0x352   :  { %664 = vsyncpa [#allocation8 + $0x1], 1 }
 0x353   :  { %665 = vsyncpa [#allocation9], 1 }
 0x354   :  { %667 = vsyncpa [#allocation9 + $0x1], 1 }
 0x355   :  { %668 = vsyncmov [#allocation3] }
 0x358   :  { %s669_s19 = vpop.sfrf %668 }
 0x359   :  { %p806_p5 = scmp.ne.s32.totalorder %s669_s19, 0 }
 0x35b   :  { %673 = shalt.err (%p806_p5)  }
 0x35c   :  { %675 = vsyncmov [#allocation3 + $0x1] }
 0x35f   :  { %s676_s3 = vpop.sfrf %675 }
 0x360   :  { %p807_p7 = scmp.ne.s32.totalorder %s676_s3, 0 }
 0x362   :  { %680 = shalt.err (%p807_p7)  }

</bundles_post_ra>
